<compile_context>
chip_gen: v6e
topology: v6e:2x2x1
jax: 0.10.0
libtpu: 0.0.40
codegen_flags: <defaults>
</compile_context>

<pallas_src>
import functools

import jax
import jax.numpy as jnp
from jax import lax
from jax.experimental import pallas as pl
from jax.experimental.pallas import tpu as pltpu


_COL0 = 8  # sublane-aligned scratch column where image column x == 0 lives


def _gelu_tanh(x):
    # TODO(synk): PyTorch nn.GELU() defaults to the exact-erf form; the tanh
    # approximation is used here (== nn.GELU(approximate='tanh'), deviation
    # ~3e-4) because erf is not a guaranteed Mosaic lowering.
    c = 0.7978845608028654  # sqrt(2/pi)
    return 0.5 * x * (1.0 + jnp.tanh(c * (x + 0.044715 * x * x * x)))


def _mlp_kernel(x_ref, w1_ref, b1_ref, wdw_ref, bdw_ref, w2_ref, b2_ref,
                out_ref, hpad_ref, *, H, W, apply_relu):
    """Fused Mlp forward for one batch element.

    x_ref   : (1, N, Cin)        tokens (bf16 or f32), N = H*W
    w1_ref  : (Cin, hidden)      fc1 weight (matmul dtype)
    b1_ref  : (1, hidden)        fc1 bias (f32)
    wdw_ref : (9, hidden)        depthwise 3x3 weight, tap-major k = 3*dy + dx
    bdw_ref : (1, hidden)        depthwise conv bias (f32)
    w2_ref  : (hidden, Cout)     fc2 weight (matmul dtype)
    b2_ref  : (1, Cout)          fc2 bias (f32)
    out_ref : (1, N, Cout)       output (f32)
    hpad_ref: (H+2, W+16, hidden) f32 scratch: zero-padded hidden image
              (image column x lives at scratch column x + _COL0).
    """
    N = H * W
    hidden = w1_ref.shape[1]

    # ---- fc1: (N, Cin) @ (Cin, hidden) + b1   (MXU, f32 accumulation) ------
    h = jnp.dot(x_ref[0], w1_ref[...], preferred_element_type=jnp.float32)
    h = h + b1_ref[...]
    if apply_relu:                           # Mlp(linear=True) path
        h = jnp.maximum(h, 0.0)

    # ---- depthwise 3x3 conv (stride 1, pad 1) on a zeroed VMEM slab --------
    hpad_ref[...] = jnp.zeros_like(hpad_ref)
    hpad_ref[1:H + 1, _COL0:_COL0 + W, :] = h.reshape(H, W, hidden)

    acc = jnp.zeros((H, W, hidden), jnp.float32)
    for k in range(9):                       # static unrolled taps
        dy, dx = k // 3, k % 3
        col = _COL0 - 1 + dx                 # padded-virtual col dx -> physical
        tap_w = wdw_ref[k:k + 1, :].reshape(1, 1, hidden)
        acc = acc + hpad_ref[dy:dy + H, col:col + W, :] * tap_w
    g = acc + bdw_ref[...].reshape(1, 1, hidden)

    # ---- activation (GELU, f32 on VPU/EUP) + dropout(p = 0) ----------------
    g = _gelu_tanh(g)
    # TODO(synk): Dropout with p>0 not implemented (module default p=0.0 is
    # identity); would need pltpu.prng_seed + pltpu.stateful_bernoulli.

    # ---- fc2: (N, hidden) @ (hidden, Cout) + b2   (MXU, f32 accumulation) --
    g2 = g.reshape(N, hidden).astype(w2_ref.dtype)
    out = jnp.dot(g2, w2_ref[...], preferred_element_type=jnp.float32)
    out_ref[0] = out + b2_ref[...]


def mlp_forward(x, params, H, W, *, linear=False, use_bf16=True):
    """Mlp forward.  x is (B, N, Cin) tokens with N == H*W (PyTorch layout)."""
    B, N, Cin = x.shape
    assert N == H * W, (N, H, W)
    hidden = params["w1"].shape[1]
    Cout = params["w2"].shape[1]

    mm_dtype = jnp.bfloat16 if use_bf16 else jnp.float32
    x_mm = x.astype(mm_dtype)
    w1 = params["w1"].astype(mm_dtype)
    w2 = params["w2"].astype(mm_dtype)
    b1 = params["b1"].reshape(1, hidden).astype(jnp.float32)
    wdw = params["wdw"].reshape(9, hidden).astype(jnp.float32)
    bdw = params["bdw"].reshape(1, hidden).astype(jnp.float32)
    b2 = params["b2"].reshape(1, Cout).astype(jnp.float32)

    kernel = functools.partial(_mlp_kernel, H=H, W=W, apply_relu=linear)

    return pl.pallas_call(
        kernel,
        out_shape=jax.ShapeDtypeStruct((B, N, Cout), jnp.float32),
        grid_spec=pltpu.PrefetchScalarGridSpec(
            num_scalar_prefetch=0,
            grid=(B,),
            in_specs=[
                pl.BlockSpec((1, N, Cin), lambda b: (b, 0, 0)),
                pl.BlockSpec((Cin, hidden), lambda b: (0, 0)),
                pl.BlockSpec((1, hidden), lambda b: (0, 0)),
                pl.BlockSpec((9, hidden), lambda b: (0, 0)),
                pl.BlockSpec((1, hidden), lambda b: (0, 0)),
                pl.BlockSpec((hidden, Cout), lambda b: (0, 0)),
                pl.BlockSpec((1, Cout), lambda b: (0, 0)),
            ],
            out_specs=pl.BlockSpec((1, N, Cout), lambda b: (b, 0, 0)),
            scratch_shapes=[pltpu.VMEM((H + 2, W + 16, hidden), jnp.float32)],
        ),
        compiler_params=pltpu.CompilerParams(
            dimension_semantics=("parallel",),
            vmem_limit_bytes=32 * 1024 * 1024,
        ),
    )(x_mm, w1, b1, wdw, bdw, w2, b2)


# ----------------------------------------------------------------------------
# Pure-JAX reference (f32, high-precision matmuls) for correctness checking.
# ----------------------------------------------------------------------------
def mlp_reference(x, params, H, W, *, linear=False):
    B, N, Cin = x.shape
    hidden = params["w1"].shape[1]
    hp = lax.Precision.HIGHEST
    h = jnp.einsum("bnc,ch->bnh", x, params["w1"], precision=hp) + params["b1"]
    if linear:
        h = jax.nn.relu(h)
    himg = h.reshape(B, H, W, hidden)
    hpad = jnp.pad(himg, ((0, 0), (1, 1), (1, 1), (0, 0)))
    wdw = params["wdw"].reshape(3, 3, hidden)
    g = jnp.zeros_like(himg)
    for dy in range(3):
        for dx in range(3):
            g = g + hpad[:, dy:dy + H, dx:dx + W, :] * wdw[dy, dx]
    g = _gelu_tanh(g + params["bdw"])
    out = jnp.einsum("bnh,ho->bno", g.reshape(B, N, hidden), params["w2"],
                     precision=hp) + params["b2"]
    return out


def make_params(key, in_features, hidden_features, out_features):
    ks = jax.random.split(key, 6)
    s = 0.15
    return {
        "w1": s * jax.random.normal(ks[0], (in_features, hidden_features), jnp.float32),
        "b1": s * jax.random.normal(ks[1], (hidden_features,), jnp.float32),
        # depthwise 3x3 weight, tap-major (k = 3*dy + dx), i.e. the PyTorch
        # (hidden, 1, 3, 3) tensor permuted to (3, 3, hidden) and flattened.
        "wdw": s * jax.random.normal(ks[2], (9, hidden_features), jnp.float32),
        "bdw": s * jax.random.normal(ks[3], (hidden_features,), jnp.float32),
        "w2": s * jax.random.normal(ks[4], (hidden_features, out_features), jnp.float32),
        "b2": s * jax.random.normal(ks[5], (out_features,), jnp.float32),
    }


if __name__ == "__main__":
    B, H, W = 2, 16, 16
    N = H * W
    in_features, hidden_features, out_features = 64, 128, 64

    key = jax.random.PRNGKey(0)
    k_x, k_p = jax.random.split(key)
    x = jax.random.normal(k_x, (B, N, in_features), jnp.float32)
    params = make_params(k_p, in_features, hidden_features, out_features)

    fwd_bf16 = jax.jit(functools.partial(mlp_forward, H=H, W=W, use_bf16=True))
    fwd_f32 = jax.jit(functools.partial(mlp_forward, H=H, W=W, use_bf16=False))

    out = jax.block_until_ready(fwd_bf16(x, params))
    out_f32 = jax.block_until_ready(fwd_f32(x, params))
    expected = mlp_reference(x, params, H, W)

    assert out.shape == (B, N, out_features), out.shape
    err_f32 = float(jnp.max(jnp.abs(out_f32 - expected)))
    err_bf16 = float(jnp.max(jnp.abs(out - expected)))
    assert jnp.allclose(out_f32, expected, atol=5e-3, rtol=5e-3), err_f32
    assert jnp.allclose(out, expected, atol=2e-2, rtol=2e-2), err_bf16

    print("KERNEL_OK")
</pallas_src>

<mosaic_0001>
module attributes {stable_mosaic.version = 11 : i64} {
  func.func @_mlp_kernel(%arg0: i32, %arg1: memref<1x256x64xbf16, #tpu.memory_space<vmem>>, %arg2: memref<64x128xbf16, #tpu.memory_space<vmem>>, %arg3: memref<1x128xf32, #tpu.memory_space<vmem>>, %arg4: memref<9x128xf32, #tpu.memory_space<vmem>>, %arg5: memref<1x128xf32, #tpu.memory_space<vmem>>, %arg6: memref<128x64xbf16, #tpu.memory_space<vmem>>, %arg7: memref<1x64xf32, #tpu.memory_space<vmem>>, %arg8: memref<1x256x64xf32, #tpu.memory_space<vmem>>, %arg9: memref<18x32x128xf32, #tpu.memory_space<vmem>>) attributes {dimension_semantics = [#tpu.dimension_semantics<parallel>], iteration_bounds = array<i64: 2>, scalar_prefetch = 0 : i64, scratch_operands = 1 : i64, tpu.core_type = #tpu.core_type<tc>, window_params = [{transform_indices = @transform_0, window_bounds = array<i64: 1, 256, 64>}, {pipeline_mode = #tpu.pipeline_mode<synchronous>, transform_indices = @transform_1, window_bounds = array<i64: 64, 128>}, {pipeline_mode = #tpu.pipeline_mode<synchronous>, transform_indices = @transform_2, window_bounds = array<i64: 1, 128>}, {pipeline_mode = #tpu.pipeline_mode<synchronous>, transform_indices = @transform_3, window_bounds = array<i64: 9, 128>}, {pipeline_mode = #tpu.pipeline_mode<synchronous>, transform_indices = @transform_4, window_bounds = array<i64: 1, 128>}, {pipeline_mode = #tpu.pipeline_mode<synchronous>, transform_indices = @transform_5, window_bounds = array<i64: 128, 64>}, {pipeline_mode = #tpu.pipeline_mode<synchronous>, transform_indices = @transform_6, window_bounds = array<i64: 1, 64>}, {transform_indices = @transform_7, window_bounds = array<i64: 1, 256, 64>}]} {
    %c0 = arith.constant 0 : index
    %c0_0 = arith.constant 0 : index
    %c0_1 = arith.constant 0 : index
    %0 = vector.load %arg1[%c0, %c0_0, %c0_1] : memref<1x256x64xbf16, #tpu.memory_space<vmem>>, vector<1x256x64xbf16>
    %1 = vector.shape_cast %0 : vector<1x256x64xbf16> to vector<256x64xbf16>
    %c0_2 = arith.constant 0 : index
    %c0_3 = arith.constant 0 : index
    %2 = vector.load %arg2[%c0_2, %c0_3] : memref<64x128xbf16, #tpu.memory_space<vmem>>, vector<64x128xbf16>
    %cst = arith.constant dense<0.000000e+00> : vector<256x128xf32>
    %3 = tpu.matmul %1, %2, %cst {dimension_numbers = #tpu.dot_dimension_numbers<[1], [0], [0], [1], [0, 0, 1, 1], [], []>} : vector<256x64xbf16>, vector<64x128xbf16>, vector<256x128xf32> -> vector<256x128xf32>
    %c0_4 = arith.constant 0 : index
    %c0_5 = arith.constant 0 : index
    %4 = vector.load %arg3[%c0_4, %c0_5] : memref<1x128xf32, #tpu.memory_space<vmem>>, vector<1x128xf32>
    %5 = vector.broadcast %4 : vector<1x128xf32> to vector<256x128xf32>
    %6 = arith.addf %3, %5 : vector<256x128xf32>
    %cst_6 = arith.constant 0.000000e+00 : f32
    %7 = vector.broadcast %cst_6 : f32 to vector<18x32x128xf32>
    %c0_7 = arith.constant 0 : index
    %c0_8 = arith.constant 0 : index
    %c0_9 = arith.constant 0 : index
    %8 = vector.load %arg9[%c0_7, %c0_8, %c0_9] : memref<18x32x128xf32, #tpu.memory_space<vmem>>, vector<18x32x128xf32>
    tpu.vector_store %arg9[%c0_7, %c0_8, %c0_9], %7 {strides = array<i32>} : memref<18x32x128xf32, #tpu.memory_space<vmem>>, vector<18x32x128xf32>,
    %9 = vector.shape_cast %6 : vector<256x128xf32> to vector<16x16x128xf32>
    %c1 = arith.constant 1 : index
    %c8 = arith.constant 8 : index
    %c0_10 = arith.constant 0 : index
    %10 = vector.load %arg9[%c1, %c8, %c0_10] : memref<18x32x128xf32, #tpu.memory_space<vmem>>, vector<16x16x128xf32>
    tpu.vector_store %arg9[%c1, %c8, %c0_10], %9 {strides = array<i32>} : memref<18x32x128xf32, #tpu.memory_space<vmem>>, vector<16x16x128xf32>,
    %cst_11 = arith.constant 0.000000e+00 : f32
    %11 = vector.broadcast %cst_11 : f32 to vector<16x16x128xf32>
    %c0_12 = arith.constant 0 : index
    %c0_13 = arith.constant 0 : index
    %12 = vector.load %arg4[%c0_12, %c0_13] : memref<9x128xf32, #tpu.memory_space<vmem>>, vector<1x128xf32>
    %13 = vector.shape_cast %12 : vector<1x128xf32> to vector<1x1x128xf32>
    %c0_14 = arith.constant 0 : index
    %c7 = arith.constant 7 : index
    %c0_15 = arith.constant 0 : index
    %14 = vector.load %arg9[%c0_14, %c7, %c0_15] : memref<18x32x128xf32, #tpu.memory_space<vmem>>, vector<16x16x128xf32>
    %15 = vector.broadcast %13 : vector<1x1x128xf32> to vector<16x16x128xf32>
    %16 = arith.mulf %14, %15 : vector<16x16x128xf32>
    %17 = arith.addf %11, %16 : vector<16x16x128xf32>
    %c1_16 = arith.constant 1 : index
    %c0_17 = arith.constant 0 : index
    %18 = vector.load %arg4[%c1_16, %c0_17] : memref<9x128xf32, #tpu.memory_space<vmem>>, vector<1x128xf32>
    %19 = vector.shape_cast %18 : vector<1x128xf32> to vector<1x1x128xf32>
    %c0_18 = arith.constant 0 : index
    %c8_19 = arith.constant 8 : index
    %c0_20 = arith.constant 0 : index
    %20 = vector.load %arg9[%c0_18, %c8_19, %c0_20] : memref<18x32x128xf32, #tpu.memory_space<vmem>>, vector<16x16x128xf32>
    %21 = vector.broadcast %19 : vector<1x1x128xf32> to vector<16x16x128xf32>
    %22 = arith.mulf %20, %21 : vector<16x16x128xf32>
    %23 = arith.addf %17, %22 : vector<16x16x128xf32>
    %c2 = arith.constant 2 : index
    %c0_21 = arith.constant 0 : index
    %24 = vector.load %arg4[%c2, %c0_21] : memref<9x128xf32, #tpu.memory_space<vmem>>, vector<1x128xf32>
    %25 = vector.shape_cast %24 : vector<1x128xf32> to vector<1x1x128xf32>
    %c0_22 = arith.constant 0 : index
    %c9 = arith.constant 9 : index
    %c0_23 = arith.constant 0 : index
    %26 = vector.load %arg9[%c0_22, %c9, %c0_23] : memref<18x32x128xf32, #tpu.memory_space<vmem>>, vector<16x16x128xf32>
    %27 = vector.broadcast %25 : vector<1x1x128xf32> to vector<16x16x128xf32>
    %28 = arith.mulf %26, %27 : vector<16x16x128xf32>
    %29 = arith.addf %23, %28 : vector<16x16x128xf32>
    %c3 = arith.constant 3 : index
    %c0_24 = arith.constant 0 : index
    %30 = vector.load %arg4[%c3, %c0_24] : memref<9x128xf32, #tpu.memory_space<vmem>>, vector<1x128xf32>
    %31 = vector.shape_cast %30 : vector<1x128xf32> to vector<1x1x128xf32>
    %c1_25 = arith.constant 1 : index
    %c7_26 = arith.constant 7 : index
    %c0_27 = arith.constant 0 : index
    %32 = vector.load %arg9[%c1_25, %c7_26, %c0_27] : memref<18x32x128xf32, #tpu.memory_space<vmem>>, vector<16x16x128xf32>
    %33 = vector.broadcast %31 : vector<1x1x128xf32> to vector<16x16x128xf32>
    %34 = arith.mulf %32, %33 : vector<16x16x128xf32>
    %35 = arith.addf %29, %34 : vector<16x16x128xf32>
    %c4 = arith.constant 4 : index
    %c0_28 = arith.constant 0 : index
    %36 = vector.load %arg4[%c4, %c0_28] : memref<9x128xf32, #tpu.memory_space<vmem>>, vector<1x128xf32>
    %37 = vector.shape_cast %36 : vector<1x128xf32> to vector<1x1x128xf32>
    %c1_29 = arith.constant 1 : index
    %c8_30 = arith.constant 8 : index
    %c0_31 = arith.constant 0 : index
    %38 = vector.load %arg9[%c1_29, %c8_30, %c0_31] : memref<18x32x128xf32, #tpu.memory_space<vmem>>, vector<16x16x128xf32>
    %39 = vector.broadcast %37 : vector<1x1x128xf32> to vector<16x16x128xf32>
    %40 = arith.mulf %38, %39 : vector<16x16x128xf32>
    %41 = arith.addf %35, %40 : vector<16x16x128xf32>
    %c5 = arith.constant 5 : index
    %c0_32 = arith.constant 0 : index
    %42 = vector.load %arg4[%c5, %c0_32] : memref<9x128xf32, #tpu.memory_space<vmem>>, vector<1x128xf32>
    %43 = vector.shape_cast %42 : vector<1x128xf32> to vector<1x1x128xf32>
    %c1_33 = arith.constant 1 : index
    %c9_34 = arith.constant 9 : index
    %c0_35 = arith.constant 0 : index
    %44 = vector.load %arg9[%c1_33, %c9_34, %c0_35] : memref<18x32x128xf32, #tpu.memory_space<vmem>>, vector<16x16x128xf32>
    %45 = vector.broadcast %43 : vector<1x1x128xf32> to vector<16x16x128xf32>
    %46 = arith.mulf %44, %45 : vector<16x16x128xf32>
    %47 = arith.addf %41, %46 : vector<16x16x128xf32>
    %c6 = arith.constant 6 : index
    %c0_36 = arith.constant 0 : index
    %48 = vector.load %arg4[%c6, %c0_36] : memref<9x128xf32, #tpu.memory_space<vmem>>, vector<1x128xf32>
    %49 = vector.shape_cast %48 : vector<1x128xf32> to vector<1x1x128xf32>
    %c2_37 = arith.constant 2 : index
    %c7_38 = arith.constant 7 : index
    %c0_39 = arith.constant 0 : index
    %50 = vector.load %arg9[%c2_37, %c7_38, %c0_39] : memref<18x32x128xf32, #tpu.memory_space<vmem>>, vector<16x16x128xf32>
    %51 = vector.broadcast %49 : vector<1x1x128xf32> to vector<16x16x128xf32>
    %52 = arith.mulf %50, %51 : vector<16x16x128xf32>
    %53 = arith.addf %47, %52 : vector<16x16x128xf32>
    %c7_40 = arith.constant 7 : index
    %c0_41 = arith.constant 0 : index
    %54 = vector.load %arg4[%c7_40, %c0_41] : memref<9x128xf32, #tpu.memory_space<vmem>>, vector<1x128xf32>
    %55 = vector.shape_cast %54 : vector<1x128xf32> to vector<1x1x128xf32>
    %c2_42 = arith.constant 2 : index
    %c8_43 = arith.constant 8 : index
    %c0_44 = arith.constant 0 : index
    %56 = vector.load %arg9[%c2_42, %c8_43, %c0_44] : memref<18x32x128xf32, #tpu.memory_space<vmem>>, vector<16x16x128xf32>
    %57 = vector.broadcast %55 : vector<1x1x128xf32> to vector<16x16x128xf32>
    %58 = arith.mulf %56, %57 : vector<16x16x128xf32>
    %59 = arith.addf %53, %58 : vector<16x16x128xf32>
    %c8_45 = arith.constant 8 : index
    %c0_46 = arith.constant 0 : index
    %60 = vector.load %arg4[%c8_45, %c0_46] : memref<9x128xf32, #tpu.memory_space<vmem>>, vector<1x128xf32>
    %61 = vector.shape_cast %60 : vector<1x128xf32> to vector<1x1x128xf32>
    %c2_47 = arith.constant 2 : index
    %c9_48 = arith.constant 9 : index
    %c0_49 = arith.constant 0 : index
    %62 = vector.load %arg9[%c2_47, %c9_48, %c0_49] : memref<18x32x128xf32, #tpu.memory_space<vmem>>, vector<16x16x128xf32>
    %63 = vector.broadcast %61 : vector<1x1x128xf32> to vector<16x16x128xf32>
    %64 = arith.mulf %62, %63 : vector<16x16x128xf32>
    %65 = arith.addf %59, %64 : vector<16x16x128xf32>
    %c0_50 = arith.constant 0 : index
    %c0_51 = arith.constant 0 : index
    %66 = vector.load %arg5[%c0_50, %c0_51] : memref<1x128xf32, #tpu.memory_space<vmem>>, vector<1x128xf32>
    %67 = vector.shape_cast %66 : vector<1x128xf32> to vector<1x1x128xf32>
    %68 = vector.broadcast %67 : vector<1x1x128xf32> to vector<16x16x128xf32>
    %69 = arith.addf %65, %68 : vector<16x16x128xf32>
    %cst_52 = arith.constant 5.000000e-01 : f32
    %70 = vector.broadcast %cst_52 : f32 to vector<16x16x128xf32>
    %71 = arith.mulf %70, %69 : vector<16x16x128xf32>
    %cst_53 = arith.constant 4.471500e-02 : f32
    %72 = vector.broadcast %cst_53 : f32 to vector<16x16x128xf32>
    %73 = arith.mulf %72, %69 : vector<16x16x128xf32>
    %74 = arith.mulf %73, %69 : vector<16x16x128xf32>
    %75 = arith.mulf %74, %69 : vector<16x16x128xf32>
    %76 = arith.addf %69, %75 : vector<16x16x128xf32>
    %cst_54 = arith.constant 0.797884583 : f32
    %77 = vector.broadcast %cst_54 : f32 to vector<16x16x128xf32>
    %78 = arith.mulf %77, %76 : vector<16x16x128xf32>
    %79 = math.tanh %78 : vector<16x16x128xf32>
    %cst_55 = arith.constant 1.000000e+00 : f32
    %80 = vector.broadcast %cst_55 : f32 to vector<16x16x128xf32>
    %81 = arith.addf %80, %79 : vector<16x16x128xf32>
    %82 = arith.mulf %71, %81 : vector<16x16x128xf32>
    %83 = vector.shape_cast %82 : vector<16x16x128xf32> to vector<256x128xf32>
    %84 = arith.truncf %83 : vector<256x128xf32> to vector<256x128xbf16>
    %c0_56 = arith.constant 0 : index
    %c0_57 = arith.constant 0 : index
    %85 = vector.load %arg6[%c0_56, %c0_57] : memref<128x64xbf16, #tpu.memory_space<vmem>>, vector<128x64xbf16>
    %cst_58 = arith.constant dense<0.000000e+00> : vector<256x64xf32>
    %86 = tpu.matmul %84, %85, %cst_58 {dimension_numbers = #tpu.dot_dimension_numbers<[1], [0], [0], [1], [0, 0, 1, 1], [], []>} : vector<256x128xbf16>, vector<128x64xbf16>, vector<256x64xf32> -> vector<256x64xf32>
    %c0_59 = arith.constant 0 : index
    %c0_60 = arith.constant 0 : index
    %87 = vector.load %arg7[%c0_59, %c0_60] : memref<1x64xf32, #tpu.memory_space<vmem>>, vector<1x64xf32>
    %88 = vector.broadcast %87 : vector<1x64xf32> to vector<256x64xf32>
    %89 = arith.addf %86, %88 : vector<256x64xf32>
    %c0_61 = arith.constant 0 : index
    %c0_62 = arith.constant 0 : index
    %c0_63 = arith.constant 0 : index
    %90 = vector.load %arg8[%c0_61, %c0_62, %c0_63] : memref<1x256x64xf32, #tpu.memory_space<vmem>>, vector<1x256x64xf32>
    %91 = vector.shape_cast %90 : vector<1x256x64xf32> to vector<256x64xf32>
    %92 = vector.shape_cast %89 : vector<256x64xf32> to vector<1x256x64xf32>
    tpu.vector_store %arg8[%c0_61, %c0_62, %c0_63], %92 {strides = array<i32>} : memref<1x256x64xf32, #tpu.memory_space<vmem>>, vector<1x256x64xf32>,
    return
  }
  func.func @transform_0(%arg0: i32) -> (i32, i32, i32) {
    %c0_i32 = arith.constant 0 : i32
    %c0_i32_0 = arith.constant 0 : i32
    %c0_i32_1 = arith.constant 0 : i32
    return %arg0, %c0_i32, %c0_i32_0 : i32, i32, i32
  }
  func.func @transform_1(%arg0: i32) -> (i32, i32) {
    %c0_i32 = arith.constant 0 : i32
    %c0_i32_0 = arith.constant 0 : i32
    %c0_i32_1 = arith.constant 0 : i32
    return %c0_i32, %c0_i32_0 : i32, i32
  }
  func.func @transform_2(%arg0: i32) -> (i32, i32) {
    %c0_i32 = arith.constant 0 : i32
    %c0_i32_0 = arith.constant 0 : i32
    %c0_i32_1 = arith.constant 0 : i32
    return %c0_i32, %c0_i32_0 : i32, i32
  }
  func.func @transform_3(%arg0: i32) -> (i32, i32) {
    %c0_i32 = arith.constant 0 : i32
    %c0_i32_0 = arith.constant 0 : i32
    %c0_i32_1 = arith.constant 0 : i32
    return %c0_i32, %c0_i32_0 : i32, i32
  }
  func.func @transform_4(%arg0: i32) -> (i32, i32) {
    %c0_i32 = arith.constant 0 : i32
    %c0_i32_0 = arith.constant 0 : i32
    %c0_i32_1 = arith.constant 0 : i32
    return %c0_i32, %c0_i32_0 : i32, i32
  }
  func.func @transform_5(%arg0: i32) -> (i32, i32) {
    %c0_i32 = arith.constant 0 : i32
    %c0_i32_0 = arith.constant 0 : i32
    %c0_i32_1 = arith.constant 0 : i32
    return %c0_i32, %c0_i32_0 : i32, i32
  }
  func.func @transform_6(%arg0: i32) -> (i32, i32) {
    %c0_i32 = arith.constant 0 : i32
    %c0_i32_0 = arith.constant 0 : i32
    %c0_i32_1 = arith.constant 0 : i32
    return %c0_i32, %c0_i32_0 : i32, i32
  }
  func.func @transform_7(%arg0: i32) -> (i32, i32, i32) {
    %c0_i32 = arith.constant 0 : i32
    %c0_i32_0 = arith.constant 0 : i32
    %c0_i32_1 = arith.constant 0 : i32
    return %arg0, %c0_i32, %c0_i32_0 : i32, i32, i32
  }
}

</mosaic_0001>

<bundles_post_ra>
// kernel: mlp_forward.1
= control target key start
LH: loop header
LB: loop body
LE: loop exit
PB: predicated region body
PF: predicated region fallthrough
CT: control target
= control target key end

     0   :  { %s2705_s24 = smov 0   ;;  %s3968_s0 = inlined_call_operand.vmem [shape: bf16[2,256,64], index: 0, kind: input, shape index: {}]   ;;  %s3969_s1 = inlined_call_operand.vmem [shape: bf16[64,128], index: 1, kind: input, shape index: {}]   ;;  %s3970_s2 = inlined_call_operand.vmem [shape: f32[1,128], index: 2, kind: input, shape index: {}]   ;;  %s3971_s3 = inlined_call_operand.vmem [shape: f32[9,128], index: 3, kind: input, shape index: {}]   ;;  %s3972_s4 = inlined_call_operand.vmem [shape: f32[1,128], index: 4, kind: input, shape index: {}]   ;;  %s3973_s5 = inlined_call_operand.vmem [shape: bf16[128,64], index: 5, kind: input, shape index: {}]   ;;  %s3974_s6 = inlined_call_operand.vmem [shape: f32[1,64], index: 6, kind: input, shape index: {}]   ;;  %s3975_s7 = inlined_call_operand.vmem [shape: f32[2,256,64], index: 7, kind: output, shape index: {}]  }
   0x1 LB: > { %s2318_s25 = sadd.s32 4294967295, %s2662_s24   ;;  %p2322_p0 = scmp.ge.s32.totalorder %s2662_s24, 1  ;;  %s2662_s24 = sphi %s2705_s24, %s17_s24  }
   0x2   : > { %p237_p1 = scmp.lt.s32.totalorder %s2662_s24, 3 }
   0x4   : > { %p238_p2 = pnand %p2322_p0, %p237_p1 }
   0x6   : > { %241 = sbr.rel (%p238_p2) target bundleno = 687 (0x2af), region = 48 }
   0xb   : > { %v2544_v0 = vld [vmem:[%s3969_s1 + $0x18] sm:$0xff]   ;;  %p269_p3 = scmp.lt.s32.totalorder %s2318_s25, 1  ;;  %v2545_v1 = vld [vmem:[%s3969_s1 + $0x10] sm:$0xff]   ;;  %vm431_vm0 = vcmask 523264   ;;  %v2546_v2 = vld [vmem:[%s3969_s1 + $0x8] sm:$0xff]   ;;  %v2664_v20 = vmov 0.0  }
   0xc   : > { %2431 = vmatprep.subr.bf16.mxu0 %v2544_v0  ;;  %v2547_v4 = vld [vmem:[%s3969_s1] sm:$0xff]   ;;  %649 = vst [vmem:[#allocation2 + $0x40] sm:$0xff] %v2664_v20  ;;  %641 = vst [vmem:[#allocation2] sm:$0xff] %v2664_v20  ;;  %v2564_v21 = vld [vmem:[%s3973_s5 + $0x38] sm:$0xff]  }
   0xd   : > { %s4118_s25 = smov (!%p269_p3, %s2318_s25), 1  ;;  %2432 = vmatpush3.bf16.msra.mxu0 %v2544_v0  ;;  %642 = vst [vmem:[#allocation2 + $0x8] sm:$0xff] %v2664_v20  ;;  %643 = vst [vmem:[#allocation2 + $0x10] sm:$0xff] %v2664_v20  ;;  %2519 = vmatprep.subr.bf16.mxu1 %v2564_v21  ;;  %v2565_v22 = vld [vmem:[%s3973_s5 + $0x30] sm:$0xff]   ;;  %v2566_v23 = vld [vmem:[%s3973_s5 + $0x28] sm:$0xff]  }
   0xe   : > { %2433 = vmatprep.subr.bf16.mxu0 %v2545_v1  ;;  %s2385_s9 = sshll.u32 %s4118_s25, 7  ;;  %644 = vst [vmem:[#allocation2 + $0x18] sm:$0xff] %v2664_v20  ;;  %645 = vst [vmem:[#allocation2 + $0x20] sm:$0xff] %v2664_v20  ;;  %2527 = vmatpush3.bf16.msra.mxu1 %v2564_v21  ;;  %v2567_v24 = vld [vmem:[%s3973_s5 + $0x20] sm:$0xff]   ;;  %v2568_v25 = vld [vmem:[%s3973_s5 + $0x18] sm:$0xff]  }
   0xf   : > { %s2728_s12 = scalar_lea.vmem %s3968_s0, %s2385_s9  ;;  %648 = vst [vmem:[#allocation2 + $0x38] sm:$0xff] %v2664_v20  ;;  %652 = vst [vmem:[#allocation2 + $0x58] sm:$0xff] %v2664_v20  ;;  %2520 = vmatprep.subr.bf16.mxu1 %v2565_v22  ;;  %v2569_v26 = vld [vmem:[%s3973_s5 + $0x10] sm:$0xff]   ;;  %v2570_v27 = vld [vmem:[%s3973_s5 + $0x8] sm:$0xff]  }
  0x10   : > { %v2548_v3 = vld [vmem:[%s2728_s12] sm:$0xff]   ;;  %v2549_v5 = vld [vmem:[%s2728_s12 + $0x8] sm:$0xff]   ;;  %v2550_v6 = vld [vmem:[%s2728_s12 + $0x10] sm:$0xff]   ;;  %653 = vst [vmem:[#allocation2 + $0x60] sm:$0xff] %v2664_v20 }
  0x11   : > { %2434 = vmatpush3.bf16.msra.mxu0 %v2545_v1  ;;  %2439 = vmatprep.mubr.msk.bf16.mxu0 %vm431_vm0, %v2548_v3  ;;  %v2551_v7 = vld [vmem:[%s2728_s12 + $0x18] sm:$0xff]   ;;  %v2552_v8 = vld [vmem:[%s2728_s12 + $0x20] sm:$0xff]   ;;  %v2553_v9 = vld [vmem:[%s2728_s12 + $0x28] sm:$0xff]   ;;  %656 = vst [vmem:[#allocation2 + $0x78] sm:$0xff] %v2664_v20 }
  0x12   : > { %2435 = vmatprep.subr.bf16.mxu0 %v2546_v2  ;;  %v2554_v10 = vld [vmem:[%s2728_s12 + $0x30] sm:$0xff]   ;;  %v2555_v11 = vld [vmem:[%s2728_s12 + $0x38] sm:$0xff]   ;;  %v2556_v12 = vld [vmem:[%s2728_s12 + $0x40] sm:$0xff]   ;;  %657 = vst [vmem:[#allocation2 + $0x80] sm:$0xff] %v2664_v20  ;;  %2528 = vmatpush3.bf16.msra.mxu1 %v2565_v22 }
  0x13   : > { %v2557_v13 = vld [vmem:[%s2728_s12 + $0x48] sm:$0xff]   ;;  %v2558_v14 = vld [vmem:[%s2728_s12 + $0x50] sm:$0xff]   ;;  %v2559_v15 = vld [vmem:[%s2728_s12 + $0x58] sm:$0xff]   ;;  %660 = vst [vmem:[#allocation2 + $0x98] sm:$0xff] %v2664_v20  ;;  %2521 = vmatprep.subr.bf16.mxu1 %v2566_v23 }
  0x14   : > { %v2560_v16 = vld [vmem:[%s2728_s12 + $0x60] sm:$0xff]   ;;  %v2561_v17 = vld [vmem:[%s2728_s12 + $0x68] sm:$0xff]   ;;  %v2562_v18 = vld [vmem:[%s2728_s12 + $0x70] sm:$0xff]   ;;  %661 = vst [vmem:[#allocation2 + $0xa0] sm:$0xff] %v2664_v20 }
  0x15   : > { %2436 = vmatpush3.bf16.msra.mxu0 %v2546_v2  ;;  %v2563_v19 = vld [vmem:[%s2728_s12 + $0x78] sm:$0xff]   ;;  %664 = vst [vmem:[#allocation2 + $0xb8] sm:$0xff] %v2664_v20  ;;  %665 = vst [vmem:[#allocation2 + $0xc0] sm:$0xff] %v2664_v20  ;;  %v2571_v28 = vld [vmem:[%s3973_s5] sm:$0xff]   ;;  %s2386_s12 = sshll.u32 %s4118_s25, 8 }
  0x16   : > { %2437 = vmatprep.subr.bf16.mxu0 %v2547_v4  ;;  %668 = vst [vmem:[#allocation2 + $0xd8] sm:$0xff] %v2664_v20  ;;  %669 = vst [vmem:[#allocation2 + $0xe0] sm:$0xff] %v2664_v20  ;;  %2529 = vmatpush3.bf16.msra.mxu1 %v2566_v23  ;;  %v2792_v29 = vld [vmem:[%s3970_s2] ss:$0 sm:$0xff]  ;;  %v747_v31 = vld [vmem:[#allocation2 + $0x7] sm:$0xff]  ;;  %s3867_s17 = scalar_lea.vmem %s3975_s7, %s2386_s12 }
  0x17   : > { %672 = vst [vmem:[#allocation2 + $0xf8] sm:$0xff] %v2664_v20  ;;  %673 = vst [vmem:[#allocation2 + $0x100] sm:$0xff] %v2664_v20  ;;  %2522 = vmatprep.subr.bf16.mxu1 %v2567_v24  ;;  %v2797_v30 = vld [vmem:[%s3971_s3] ss:$0 sm:$0xff]  ;;  %v748_v32 = vld [vmem:[#allocation2 + $0xf] sm:$0xff] }
  0x18   : > { %676 = vst [vmem:[#allocation2 + $0x118] sm:$0xff] %v2664_v20  ;;  %677 = vst [vmem:[#allocation2 + $0x120] sm:$0xff] %v2664_v20  ;;  %v2802_v34 = vld [vmem:[%s3971_s3 + $0x1] ss:$0 sm:$0xff]  ;;  %v783_v36 = vmul.f32 %v2797_v30, %v747_v31  ;;  %v2810_v39 = vld [vmem:[%s3971_s3 + $0x2] ss:$0 sm:$0xff]  ;;  %v784_v40 = vmul.f32 %v2797_v30, %v748_v32 }
  0x19   : > { %2438 = vmatpush3.bf16.msra.mxu0 %v2547_v4  ;;  %680 = vst [vmem:[#allocation2 + $0x138] sm:$0xff] %v2664_v20  ;;  %681 = vst [vmem:[#allocation2 + $0x140] sm:$0xff] %v2664_v20  ;;  %v884_v37 = vmul.f32 0.0, %v2802_v34  ;;  %v949_v41 = vld [vmem:[#allocation2 + $0x9] sm:$0xff]  ;;  %v950_v43 = vld [vmem:[#allocation2 + $0x11] sm:$0xff] }
  0x1a   : > { %684 = vst [vmem:[#allocation2 + $0x158] sm:$0xff] %v2664_v20  ;;  %685 = vst [vmem:[#allocation2 + $0x160] sm:$0xff] %v2664_v20  ;;  %2471 = vmatprep.subr.bf16.mxu0 %v2564_v21  ;;  %2530 = vmatpush3.bf16.msra.mxu1 %v2567_v24  ;;  %v985_v47 = vmul.f32 %v2810_v39, %v949_v41  ;;  %v986_v50 = vmul.f32 %v2810_v39, %v950_v43  ;;  %v2820_v51 = vld [vmem:[%s3971_s3 + $0x4] ss:$0 sm:$0xff]  ;;  %v2826_v53 = vld [vmem:[%s3971_s3 + $0x7] ss:$0 sm:$0xff] }
  0x1b   : > { %688 = vst [vmem:[#allocation2 + $0x178] sm:$0xff] %v2664_v20  ;;  %689 = vst [vmem:[#allocation2 + $0x180] sm:$0xff] %v2664_v20  ;;  %2523 = vmatprep.subr.bf16.mxu1 %v2568_v25  ;;  %v916_v46 = vadd.f32 %v884_v37, %v783_v36  ;;  %v917_v49 = vadd.f32 %v884_v37, %v784_v40  ;;  %v2839_v63 = vld [vmem:[%s3971_s3 + $0x3] ss:$0 sm:$0xff]  ;;  %v2849_v3 = vld [vmem:[%s3971_s3 + $0x6] ss:$0 sm:$0xff] }
  0x1c   : > { %2440 = vmatmul.mubr.msk.bf16.vlgmr.msra.gmra.mxu0 %vm431_vm0, %v2549_v5  ;;  %692 = vst [vmem:[#allocation2 + $0x198] sm:$0xff] %v2664_v20  ;;  %693 = vst [vmem:[#allocation2 + $0x1a0] sm:$0xff] %v2664_v20 }
  0x1d   : > { %2443 = vmatprep.mubr.msk.bf16.mxu0 %vm431_vm0, %v2550_v6  ;;  %696 = vst [vmem:[#allocation2 + $0x1b8] sm:$0xff] %v2664_v20  ;;  %697 = vst [vmem:[#allocation2 + $0x1c0] sm:$0xff] %v2664_v20  ;;  %2472 = vmatpush3.bf16.msra.mxu0 %v2564_v21  ;;  %v1017_v56 = vadd.f32 %v985_v47, %v916_v46  ;;  %v1018_v60 = vadd.f32 %v986_v50, %v917_v49 }
  0x1e   : > { %700 = vst [vmem:[#allocation2 + $0x1d8] sm:$0xff] %v2664_v20  ;;  %701 = vst [vmem:[#allocation2 + $0x1e0] sm:$0xff] %v2664_v20  ;;  %2473 = vmatprep.subr.bf16.mxu0 %v2565_v22  ;;  %2531 = vmatpush3.bf16.msra.mxu1 %v2568_v25 }
  0x1f   : > { %704 = vst [vmem:[#allocation2 + $0x1f8] sm:$0xff] %v2664_v20  ;;  %705 = vst [vmem:[#allocation2 + $0x200] sm:$0xff] %v2664_v20  ;;  %2524 = vmatprep.subr.bf16.mxu1 %v2569_v26 }
  0x20   : > { %708 = vst [vmem:[#allocation2 + $0x218] sm:$0xff] %v2664_v20  ;;  %709 = vst [vmem:[#allocation2 + $0x220] sm:$0xff] %v2664_v20 }
  0x21   : > { %710 = vst [vmem:[#allocation2 + $0x228] sm:$0xff] %v2664_v20  ;;  %711 = vst [vmem:[#allocation2 + $0x230] sm:$0xff] %v2664_v20  ;;  %2474 = vmatpush3.bf16.msra.mxu0 %v2565_v22 }
  0x22   : > { %712 = vst [vmem:[#allocation2 + $0x238] sm:$0xff] %v2664_v20  ;;  %2475 = vmatprep.subr.bf16.mxu0 %v2566_v23  ;;  %2532 = vmatpush3.bf16.msra.mxu1 %v2569_v26 }
  0x23   : > { %2525 = vmatprep.subr.bf16.mxu1 %v2570_v27 }
  0x24   : > { %2444 = vmatmul.mubr.msk.bf16.gmra.mxu0 %vm431_vm0, %v2551_v7 }
  0x25   : > { %2447 = vmatprep.mubr.msk.bf16.mxu0 %vm431_vm0, %v2552_v8  ;;  %2476 = vmatpush3.bf16.msra.mxu0 %v2566_v23 }
  0x26   : > { %2477 = vmatprep.subr.bf16.mxu0 %v2567_v24  ;;  %2533 = vmatpush3.bf16.msra.mxu1 %v2570_v27 }
  0x27   : > { %2526 = vmatprep.subr.bf16.mxu1 %v2571_v28 }
  0x29   : > { %2478 = vmatpush3.bf16.msra.mxu0 %v2567_v24 }
  0x2a   : > { %2479 = vmatprep.subr.bf16.mxu0 %v2568_v25  ;;  %2534 = vmatpush3.bf16.msra.mxu1 %v2571_v28 }
  0x2c   : > { %2448 = vmatmul.mubr.msk.bf16.gmra.mxu0 %vm431_vm0, %v2553_v9 }
  0x2d   : > { %2451 = vmatprep.mubr.msk.bf16.mxu0 %vm431_vm0, %v2554_v10  ;;  %2480 = vmatpush3.bf16.msra.mxu0 %v2568_v25 }
  0x2e   : > { %2481 = vmatprep.subr.bf16.mxu0 %v2569_v26 }
  0x31   : > { %2482 = vmatpush3.bf16.msra.mxu0 %v2569_v26 }
  0x32   : > { %2483 = vmatprep.subr.bf16.mxu0 %v2570_v27 }
  0x34   : > { %2452 = vmatmul.mubr.msk.bf16.gmra.mxu0 %vm431_vm0, %v2555_v11 }
  0x35   : > { %2455 = vmatprep.mubr.msk.bf16.mxu0 %vm431_vm0, %v2556_v12  ;;  %2484 = vmatpush3.bf16.msra.mxu0 %v2570_v27 }
  0x36   : > { %2485 = vmatprep.subr.bf16.mxu0 %v2571_v28 }
  0x39   : > { %2486 = vmatpush3.bf16.msra.mxu0 %v2571_v28 }
  0x3c   : > { %2456 = vmatmul.mubr.msk.bf16.gmra.mxu0 %vm431_vm0, %v2557_v13 }
  0x3d   : > { %2459 = vmatprep.mubr.msk.bf16.mxu0 %vm431_vm0, %v2558_v14 }
  0x44   : > { %2460 = vmatmul.mubr.msk.bf16.gmra.mxu0 %vm431_vm0, %v2559_v15 }
  0x45   : > { %2463 = vmatprep.mubr.msk.bf16.mxu0 %vm431_vm0, %v2560_v16 }
  0x4c   : > { %2464 = vmatmul.mubr.msk.bf16.gmra.mxu0 %vm431_vm0, %v2561_v17  ;;  %v2872_v17 = vld [vmem:[%s3971_s3 + $0x5] ss:$0 sm:$0xff] }
  0x4d   : > { %2467 = vmatprep.mubr.msk.bf16.mxu0 %vm431_vm0, %v2562_v18 }
  0x54   : > { %2468 = vmatmul.mubr.msk.bf16.gmra.mxu0 %vm431_vm0, %v2563_v19 }
  0xdc   : > { %v2441_v33 = vpop.f32.mrf.mxu0 }
  0xdd   : > { %v523_v35 = vadd.f32 %v2441_v33, %v2792_v29 }
  0xde   : > { %v514_v38 = vpop.f32.mrf.mxu0 }
  0xdf   : > { %716 = vst [vmem:[#allocation2 + $0x48] sm:$0xff] %v523_v35  ;;  %v515_v42 = vadd.f32 %v2792_v29, %v514_v38  ;;  %v2830_v58 = vmul.f32 %v2820_v51, %v523_v35  ;;  %v2833_v61 = vmul.f32 %v2826_v53, %v523_v35  ;;  %v888_v62 = vmul.f32 %v2802_v34, %v523_v35 }
  0xe0   : > { %v2442_v44 = vpop.f32.mrf.mxu0 }
  0xe1   : > { %714 = vst [vmem:[#allocation2 + $0x28] sm:$0xff] %v515_v42  ;;  %v526_v45 = vadd.f32 %v2442_v44, %v2792_v29  ;;  %v886_v0 = vmul.f32 %v2802_v34, %v515_v42  ;;  %v1187_v4 = vmul.f32 %v2820_v51, %v515_v42 }
  0xe2   : > { %v517_v48 = vpop.f32.mrf.mxu0 }
  0xe3   : > { %717 = vst [vmem:[#allocation2 + $0x50] sm:$0xff] %v526_v45  ;;  %v518_v52 = vadd.f32 %v2792_v29, %v517_v48  ;;  %v2843_v1 = vmul.f32 %v2820_v51, %v526_v45  ;;  %v2854_v8 = vmul.f32 %v2826_v53, %v526_v45  ;;  %v2858_v10 = vmul.f32 %v2802_v34, %v526_v45 }
  0xe4   : > { %v2445_v54 = vpop.f32.mrf.mxu0 }
  0xe5   : > { %715 = vst [vmem:[#allocation2 + $0x30] sm:$0xff] %v518_v52  ;;  %v539_v55 = vadd.f32 %v2445_v54, %v2792_v29  ;;  %v887_v6 = vmul.f32 %v2802_v34, %v518_v52  ;;  %v1188_v14 = vmul.f32 %v2820_v51, %v518_v52 }
  0xe6   : > { %v751_v57 = vld [vmem:[#allocation2 + $0x47] sm:$0xff]  ;;  %v530_v59 = vpop.f32.mrf.mxu0 }
  0xe7   : > { %720 = vst [vmem:[#allocation2 + $0x88] sm:$0xff] %v539_v55  ;;  %v531_v2 = vadd.f32 %v2792_v29, %v530_v59  ;;  %v787_v9 = vmul.f32 %v2797_v30, %v751_v57  ;;  %v1088_v15 = vmul.f32 %v2839_v63, %v751_v57  ;;  %v2877_v19 = vmul.f32 %v2802_v34, %v539_v55 }
  0xe8   : > { %v749_v5 = vld [vmem:[#allocation2 + $0x27] sm:$0xff]  ;;  %v2446_v7 = vpop.f32.mrf.mxu0  ;;  %v1390_v21 = vmul.f32 %v2849_v3, %v751_v57  ;;  %v2881_v22 = vmul.f32 %v2826_v53, %v539_v55 }
  0xe9   : > { %v785_v11 = vmul.f32 %v2797_v30, %v749_v5  ;;  %718 = vst [vmem:[#allocation2 + $0x68] sm:$0xff] %v531_v2  ;;  %v2862_v12 = vadd.f32 %v2446_v7, %v2792_v29  ;;  %v1086_v13 = vmul.f32 %v2839_v63, %v749_v5  ;;  %3991 = vst [vmem:[#allocation3_spill] sm:$0xff] %v2877_v19 }
  0xea   : > { %v2867_v16 = vld [vmem:[#allocation2 + $0x4f] sm:$0xff]  ;;  %v533_v20 = vpop.f32.mrf.mxu0  ;;  %v2886_v24 = vmul.f32 %v2802_v34, %v531_v2  ;;  %v2890_v25 = vmul.f32 %v2826_v53, %v531_v2  ;;  %v2892_v26 = vadd.f32 %v888_v62, %v787_v9  ;;  %v2895_v27 = vmul.f32 %v2820_v51, %v531_v2 }
  0xeb   : > { %v2874_v18 = vld [vmem:[#allocation2 + $0x49] sm:$0xff]  ;;  %v2883_v23 = vld [vmem:[#allocation2 + $0x51] sm:$0xff]  ;;  %721 = vst [vmem:[#allocation2 + $0x90] sm:$0xff] %v2862_v12  ;;  %v918_v28 = vadd.f32 %v886_v0, %v785_v11  ;;  %v1089_v31 = vmul.f32 %v2839_v63, %v2867_v16  ;;  %v2900_v36 = vadd.f32 %v2792_v29, %v533_v20  ;;  %v1118_v38 = vadd.f32 %v1086_v13, %v1017_v56 }
  0xec   : > { %v750_v32 = vld [vmem:[#allocation2 + $0x2f] sm:$0xff]  ;;  %v2449_v37 = vpop.f32.mrf.mxu0  ;;  %v2904_v40 = vmul.f32 %v2872_v17, %v2874_v18  ;;  %v2911_v44 = vmul.f32 %v2872_v17, %v2883_v23  ;;  %v2921_v55 = vmul.f32 %v2802_v34, %v2862_v12  ;;  %v1391_v2 = vmul.f32 %v2849_v3, %v2867_v16 }
  0xed   : > { %v951_v33 = vld [vmem:[#allocation2 + $0x29] sm:$0xff]  ;;  %v952_v35 = vld [vmem:[#allocation2 + $0x31] sm:$0xff]  ;;  %v786_v41 = vmul.f32 %v2797_v30, %v750_v32  ;;  %v555_v43 = vadd.f32 %v2449_v37, %v2792_v29  ;;  %719 = vst [vmem:[#allocation2 + $0x70] sm:$0xff] %v2900_v36  ;;  %v1087_v47 = vmul.f32 %v2839_v63, %v750_v32  ;;  %v1219_v48 = vadd.f32 %v1187_v4, %v1118_v38 }
  0xee   : > { %v987_v42 = vmul.f32 %v2810_v39, %v951_v33  ;;  %v2913_v45 = vld [vmem:[#allocation2 + $0x87] sm:$0xff]  ;;  %v546_v46 = vpop.f32.mrf.mxu0  ;;  %v1288_v49 = vmul.f32 %v2872_v17, %v951_v33  ;;  %v988_v52 = vmul.f32 %v2810_v39, %v952_v35  ;;  %3992 = vst [vmem:[#allocation4_spill] sm:$0xff] %v2921_v55  ;;  %v2936_v7 = vmul.f32 %v2802_v34, %v2900_v36 }
  0xef   : > { %v919_v50 = vadd.f32 %v887_v6, %v786_v41  ;;  %724 = vst [vmem:[#allocation2 + $0xc8] sm:$0xff] %v555_v43  ;;  %v2926_v57 = vadd.f32 %v2792_v29, %v546_v46  ;;  %v1119_v62 = vadd.f32 %v1087_v47, %v1018_v60  ;;  %v2932_v6 = vmul.f32 %v2797_v30, %v2913_v45 }
  0xf0   : > { %v1019_v54 = vadd.f32 %v987_v42, %v918_v28  ;;  %v2923_v56 = vld [vmem:[#allocation2 + $0x67] sm:$0xff]  ;;  %v2450_v59 = vpop.f32.mrf.mxu0  ;;  %v1320_v0 = vadd.f32 %v1288_v49, %v1219_v48  ;;  %v2954_v38 = vmul.f32 %v2802_v34, %v555_v43 }
  0xf1   : > { %v1020_v4 = vadd.f32 %v988_v52, %v919_v50  ;;  %3993 = vst [vmem:[#allocation5_spill] sm:$0xff] %v2932_v6  ;;  %722 = vst [vmem:[#allocation2 + $0xa8] sm:$0xff] %v2926_v57  ;;  %v558_v60 = vadd.f32 %v2450_v59, %v2792_v29  ;;  %v1220_v20 = vadd.f32 %v1188_v14, %v1119_v62  ;;  %v2963_v14 = vld [vmem:[%s3971_s3 + $0x8] ss:$0 sm:$0xff] }
  0xf2   : > { %v1120_v5 = vadd.f32 %v1088_v15, %v1019_v54  ;;  %v2938_v9 = vld [vmem:[#allocation2 + $0x8f] sm:$0xff]  ;;  %v549_v13 = vpop.f32.mrf.mxu0  ;;  %v1289_v15 = vmul.f32 %v2872_v17, %v952_v35  ;;  %v1422_v28 = vadd.f32 %v1390_v21, %v1320_v0  ;;  %v2947_v32 = vmul.f32 %v2797_v30, %v2923_v56  ;;  %3994 = vst [vmem:[#allocation6_spill] sm:$0xff] %v2954_v38 }
  0xf3   : > { %v2940_v11 = vld [vmem:[#allocation2 + $0x89] sm:$0xff]  ;;  %v1392_v33 = vmul.f32 %v2849_v3, %v2923_v56  ;;  %v2951_v37 = vld [vmem:[#allocation2 + $0x91] sm:$0xff]  ;;  %v2958_v41 = vmul.f32 %v2802_v34, %v2926_v57  ;;  %v1121_v21 = vadd.f32 %v1089_v31, %v1020_v4  ;;  %725 = vst [vmem:[#allocation2 + $0xd0] sm:$0xff] %v558_v60  ;;  %v2966_v35 = vadd.f32 %v2792_v29, %v549_v13 }
  0xf4   : > { %v2453_v42 = vpop.f32.mrf.mxu0  ;;  %v1321_v46 = vadd.f32 %v1289_v15, %v1220_v20  ;;  %v1523_v47 = vadd.f32 %v2833_v61, %v1422_v28  ;;  %v2971_v43 = vmul.f32 %v2797_v30, %v2938_v9  ;;  %v2975_v48 = vmul.f32 %v2810_v39, %v2940_v11  ;;  %v2977_v49 = vld [vmem:[#allocation2 + $0x6f] sm:$0xff]  ;;  %v3015_v15 = vld [vmem:[%s3972_s4] ss:$0 sm:$0xff] }
  0xf5   : > { %3995 = vst [vmem:[#allocation7_spill] sm:$0xff] %v2958_v41  ;;  %3996 = vst [vmem:[#allocation8_spill] sm:$0xff] %v2966_v35  ;;  %v2979_v50 = vld [vmem:[#allocation2 + $0x69] sm:$0xff]  ;;  %v2981_v31 = vld [vmem:[#allocation2 + $0x71] sm:$0xff]  ;;  %v571_v52 = vadd.f32 %v2453_v42, %v2792_v29  ;;  %v1221_v54 = vadd.f32 %v2830_v58, %v1120_v5  ;;  %v2987_v61 = vmul.f32 %v2810_v39, %v2951_v37 }
  0xf6   : > { %3997 = vst [vmem:[#allocation9_spill] sm:$0xff] %v2971_v43  ;;  %3998 = vst [vmem:[#allocation10_spill] sm:$0xff] %v2975_v48  ;;  %v2989_v59 = vld [vmem:[#allocation2 + $0xc7] sm:$0xff]  ;;  %v2992_v62 = vmul.f32 %v2802_v34, %v558_v60  ;;  %v562_v0 = vpop.f32.mrf.mxu0  ;;  %v1592_v4 = vmul.f32 %v2963_v14, %v2874_v18  ;;  %v1593_v13 = vmul.f32 %v2963_v14, %v2883_v23 }
  0xf7   : > { %3999 = vst [vmem:[#allocation11_spill] sm:$0xff] %v2987_v61  ;;  %4000 = vst [vmem:[#allocation12_spill] sm:$0xff] %v2989_v59  ;;  %v3001_v58 = vmul.f32 %v2797_v30, %v2977_v49  ;;  %v3005_v5 = vmul.f32 %v2810_v39, %v2979_v50  ;;  %v3009_v60 = vmul.f32 %v2810_v39, %v2981_v31 }
  0xf8   : > { %4001 = vst [vmem:[#allocation13_spill] sm:$0xff] %v2992_v62  ;;  %723 = vst [vmem:[#allocation2 + $0xb0] sm:$0xff] %v2966_v35  ;;  %v563_v20 = vadd.f32 %v2792_v29, %v562_v0  ;;  %v2454_v28 = vpop.f32.mrf.mxu0  ;;  %v1423_v42 = vadd.f32 %v1391_v2, %v1321_v46  ;;  %v1624_v62 = vadd.f32 %v1592_v4, %v1523_v47  ;;  %v3025_v0 = vld [vmem:[#allocation2 + $0xa7] sm:$0xff] }
  0xf9   : > { %728 = vst [vmem:[#allocation2 + $0x108] sm:$0xff] %v571_v52  ;;  %v1222_v38 = vadd.f32 %v2843_v1, %v1121_v21  ;;  %v1322_v41 = vadd.f32 %v2904_v40, %v1221_v54  ;;  %v1393_v61 = vmul.f32 %v2849_v3, %v2977_v49  ;;  %v3023_v48 = vmul.f32 %v2797_v30, %v2989_v59 }
  0xfa   : > { %v3029_v55 = vmul.f32 %v2802_v34, %v2966_v35  ;;  %726 = vst [vmem:[#allocation2 + $0xe8] sm:$0xff] %v563_v20  ;;  %v574_v2 = vadd.f32 %v2454_v28, %v2792_v29  ;;  %v3033_v1 = vmul.f32 %v2802_v34, %v571_v52  ;;  %v3036_v40 = vmul.f32 %v2802_v34, %v563_v20  ;;  %v565_v21 = vpop.f32.mrf.mxu0  ;;  %v3044_v4 = vld [vmem:[#allocation2 + $0xcf] sm:$0xff] }
  0xfb   : > { %4002 = vst [vmem:[#allocation14_spill] sm:$0xff] %v3023_v48  ;;  %v1524_v46 = vadd.f32 %v2854_v8, %v1423_v42  ;;  %v1663_v47 = vadd.f32 %v3015_v15, %v1624_v62  ;;  %v3042_v54 = vmul.f32 %v2797_v30, %v3025_v0  ;;  %4007 = vst [vmem:[#allocation19_spill] sm:$0xff] %v3044_v4  ;;  %v961_v48 = vld [vmem:[#allocation2 + $0xc9] sm:$0xff]  ;;  %v962_v59 = vld [vmem:[#allocation2 + $0xd1] sm:$0xff] }
  0xfc   : > { %4003 = vst [vmem:[#allocation15_spill] sm:$0xff] %v3029_v55  ;;  %4004 = vst [vmem:[#allocation16_spill] sm:$0xff] %v3033_v1  ;;  %v566_v52 = vadd.f32 %v2792_v29, %v565_v21  ;;  %v1494_v20 = vmul.f32 %v2826_v53, %v2900_v36  ;;  %v1594_v28 = vmul.f32 %v2963_v14, %v2979_v50  ;;  %v2457_v62 = vpop.f32.mrf.mxu0 }
  0xfd   : > { %4005 = vst [vmem:[#allocation17_spill] sm:$0xff] %v3036_v40  ;;  %4006 = vst [vmem:[#allocation18_spill] sm:$0xff] %v3042_v54  ;;  %v3052_v8 = vmul.f32 %v2802_v34, %v574_v2  ;;  %v1625_v42 = vadd.f32 %v1593_v13, %v1524_v46  ;;  %v1323_v1 = vadd.f32 %v2911_v44, %v1222_v38  ;;  %v1727_v19 = vmul.f32 0.044715, %v1663_v47 }
  0xfe   : > { %729 = vst [vmem:[#allocation2 + $0x110] sm:$0xff] %v574_v2  ;;  %v1424_v40 = vadd.f32 %v1392_v33, %v1322_v41  ;;  %v3057_v55 = vmul.f32 %v2797_v30, %v3044_v4  ;;  %727 = vst [vmem:[#allocation2 + $0xf0] sm:$0xff] %v566_v52  ;;  %v587_v43 = vadd.f32 %v2457_v62, %v2792_v29  ;;  %v578_v46 = vpop.f32.mrf.mxu0 }
  0xff   : > { %4008 = vst [vmem:[#allocation20_spill] sm:$0xff] %v3052_v8  ;;  %v3059_v54 = vld [vmem:[#allocation2 + $0xaf] sm:$0xff]  ;;  %v1595_v2 = vmul.f32 %v2963_v14, %v2981_v31  ;;  %v3067_v13 = vmul.f32 %v2810_v39, %v961_v48  ;;  %v3070_v44 = vmul.f32 %v2810_v39, %v962_v59  ;;  %v3077_v41 = vmul.f32 %v2802_v34, %v566_v52 }
 0x100   : > { %4009 = vst [vmem:[#allocation21_spill] sm:$0xff] %v3057_v55  ;;  %v3061_v21 = vld [vmem:[#allocation2 + $0xa9] sm:$0xff]  ;;  %v3072_v33 = vld [vmem:[#allocation2 + $0xb1] sm:$0xff]  ;;  %v1664_v62 = vadd.f32 %v3015_v15, %v1625_v42  ;;  %v3082_v8 = vmul.f32 %v2797_v30, %v3059_v54  ;;  %732 = vst [vmem:[#allocation2 + $0x148] sm:$0xff] %v587_v43  ;;  %v579_v48 = vadd.f32 %v2792_v29, %v578_v46  ;;  %v2458_v52 = vpop.f32.mrf.mxu0 }
 0x101   : > { %4010 = vst [vmem:[#allocation22_spill] sm:$0xff] %v3061_v21  ;;  %4011 = vst [vmem:[#allocation23_spill] sm:$0xff] %v3067_v13  ;;  %v3074_v38 = vld [vmem:[#allocation2 + $0x107] sm:$0xff]  ;;  %v3085_v13 = vmul.f32 0.5, %v1663_v47  ;;  %v1759_v59 = vmul.f32 %v1727_v19, %v1663_v47  ;;  %v1425_v4 = vadd.f32 %v1393_v61, %v1323_v1  ;;  %v1525_v42 = vadd.f32 %v2890_v25, %v1424_v40 }
 0x102   : > { %4012 = vst [vmem:[#allocation24_spill] sm:$0xff] %v3070_v44  ;;  %4013 = vst [vmem:[#allocation25_spill] sm:$0xff] %v3072_v33  ;;  %v3089_v44 = vmul.f32 %v2810_v39, %v3061_v21  ;;  %v3091_v55 = vld [vmem:[#allocation2 + $0xe7] sm:$0xff]  ;;  %v3100_v46 = vmul.f32 %v2797_v30, %v3074_v38  ;;  %v590_v19 = vadd.f32 %v2458_v52, %v2792_v29  ;;  %v581_v25 = vpop.f32.mrf.mxu0 }
 0x103   : > { %4014 = vst [vmem:[#allocation26_spill] sm:$0xff] %v3074_v38  ;;  %4015 = vst [vmem:[#allocation27_spill] sm:$0xff] %v3077_v41  ;;  %v1728_v41 = vmul.f32 0.044715, %v1664_v62  ;;  %v1791_v6 = vmul.f32 %v1759_v59, %v1663_v47  ;;  %v3106_v61 = vmul.f32 %v2802_v34, %v587_v43  ;;  %v1526_v40 = vadd.f32 %v1494_v20, %v1425_v4 }
 0x104   : > { %4016 = vst [vmem:[#allocation28_spill] sm:$0xff] %v3082_v8  ;;  %4017 = vst [vmem:[#allocation29_spill] sm:$0xff] %v3089_v44  ;;  %v3096_v8 = vmul.f32 %v2810_v39, %v3072_v33  ;;  %v1626_v33 = vadd.f32 %v1594_v28, %v1525_v42  ;;  %v3115_v59 = vmul.f32 0.5, %v1664_v62  ;;  %v788_v52 = vmul.f32 %v2797_v30, %v2867_v16  ;;  %v2461_v4 = vpop.f32.mrf.mxu0 }
 0x105   : > { %4018 = vst [vmem:[#allocation30_spill] sm:$0xff] %v3091_v55  ;;  %4020 = vst [vmem:[#allocation32_spill] sm:$0xff] %v3100_v46  ;;  %v3103_v44 = vld [vmem:[#allocation2 + $0x10f] sm:$0xff]  ;;  %v1760_v1 = vmul.f32 %v1728_v41, %v1664_v62  ;;  %v3113_v46 = vmul.f32 %v2802_v34, %v579_v48  ;;  %v582_v41 = vadd.f32 %v2792_v29, %v581_v25 }
 0x106   : > { %4019 = vst [vmem:[#allocation31_spill] sm:$0xff] %v3096_v8  ;;  %730 = vst [vmem:[#allocation2 + $0x128] sm:$0xff] %v579_v48  ;;  %v965_v21 = vld [vmem:[#allocation2 + $0x109] sm:$0xff]  ;;  %v966_v35 = vld [vmem:[#allocation2 + $0x111] sm:$0xff]  ;;  %v3110_v8 = vmul.f32 %v2797_v30, %v3091_v55  ;;  %v1823_v28 = vadd.f32 %v1791_v6, %v1663_v47  ;;  %v1627_v42 = vadd.f32 %v1595_v2, %v1526_v40  ;;  %v594_v6 = vpop.f32.mrf.mxu0 }
 0x107   : > { %4021 = vst [vmem:[#allocation33_spill] sm:$0xff] %v3103_v44  ;;  %4022 = vst [vmem:[#allocation34_spill] sm:$0xff] %v3106_v61  ;;  %v3119_v38 = vld [vmem:[#allocation2 + $0xef] sm:$0xff]  ;;  %v1792_v20 = vmul.f32 %v1760_v1, %v1664_v62  ;;  %v3124_v61 = vmul.f32 %v2797_v30, %v3103_v44  ;;  %v3127_v48 = vmul.f32 %v2810_v39, %v965_v21  ;;  %v3133_v55 = vld [vmem:[#allocation2 + $0x147] sm:$0xff] }
 0x108   : > { %4023 = vst [vmem:[#allocation35_spill] sm:$0xff] %v3110_v8  ;;  %4024 = vst [vmem:[#allocation36_spill] sm:$0xff] %v3113_v46  ;;  %v963_v43 = vld [vmem:[#allocation2 + $0xe9] sm:$0xff]  ;;  %v3130_v46 = vmul.f32 %v2810_v39, %v966_v35  ;;  %v964_v16 = vld [vmem:[#allocation2 + $0xf1] sm:$0xff]  ;;  %v603_v8 = vadd.f32 %v2461_v4, %v2792_v29  ;;  %v3136_v25 = vmul.f32 %v2802_v34, %v590_v19  ;;  %v1855_v2 = vmul.f32 0.7978846, %v1823_v28 }
 0x109   : > { %733 = vst [vmem:[#allocation2 + $0x150] sm:$0xff] %v590_v19  ;;  %4025 = vst [vmem:[#allocation37_spill] sm:$0xff] %v3124_v61  ;;  %v1824_v47 = vadd.f32 %v1792_v20, %v1664_v62  ;;  %v1665_v1 = vadd.f32 %v3015_v15, %v1626_v33  ;;  %v3141_v21 = vmul.f32 %v2797_v30, %v3119_v38  ;;  %v2462_v62 = vpop.f32.mrf.mxu0 }
 0x10a   : > { %4026 = vst [vmem:[#allocation38_spill] sm:$0xff] %v3127_v48  ;;  %4027 = vst [vmem:[#allocation39_spill] sm:$0xff] %v3130_v46  ;;  %v3144_v35 = vmul.f32 %v2810_v39, %v963_v43  ;;  %v595_v40 = vadd.f32 %v2792_v29, %v594_v6  ;;  %v1666_v4 = vadd.f32 %v3015_v15, %v1627_v42  ;;  %2572 = vtanh.f32 %v1855_v2 }
 0x10b   : > { %4028 = vst [vmem:[#allocation40_spill] sm:$0xff] %v3133_v55  ;;  %4029 = vst [vmem:[#allocation41_spill] sm:$0xff] %v3136_v25  ;;  %v3149_v19 = vmul.f32 %v2810_v39, %v964_v16  ;;  %v1856_v20 = vmul.f32 0.7978846, %v1824_v47  ;;  %v1729_v33 = vmul.f32 0.044715, %v1665_v1  ;;  %v3155_v28 = vmul.f32 %v2797_v30, %v3133_v55  ;;  %v597_v47 = vpop.f32.mrf.mxu0 }
 0x10c   : > { %731 = vst [vmem:[#allocation2 + $0x130] sm:$0xff] %v582_v41  ;;  %736 = vst [vmem:[#allocation2 + $0x188] sm:$0xff] %v603_v8  ;;  %v3158_v43 = vmul.f32 %v2802_v34, %v582_v41  ;;  %v3161_v6 = vmul.f32 %v2802_v34, %v603_v8  ;;  %v606_v42 = vadd.f32 %v2462_v62, %v2792_v29  ;;  %v3166_v2 = vmul.f32 0.5, %v1665_v1 }
 0x10d   : > { %4030 = vst [vmem:[#allocation42_spill] sm:$0xff] %v3149_v19  ;;  %v3151_v25 = vld [vmem:[#allocation2 + $0x127] sm:$0xff]  ;;  %4032 = vst [vmem:[#allocation44_spill] sm:$0xff] %v3155_v28  ;;  %2574 = vtanh.f32 %v1856_v20  ;;  %v1730_v61 = vmul.f32 0.044715, %v1666_v4  ;;  %v1761_v55 = vmul.f32 %v1729_v33, %v1665_v1  ;;  %v3173_v8 = vmul.f32 %v2802_v34, %v595_v40 }
 0x10e   : > { %4031 = vst [vmem:[#allocation43_spill] sm:$0xff] %v3151_v25  ;;  %4033 = vst [vmem:[#allocation45_spill] sm:$0xff] %v3158_v43  ;;  %v3170_v41 = vmul.f32 %v2797_v30, %v3151_v25  ;;  %v921_v62 = vadd.f32 %v2858_v10, %v788_v52  ;;  %v598_v28 = vadd.f32 %v2792_v29, %v597_v47  ;;  %v2465_v43 = vpop.f32.mrf.mxu0 }
 0x10f   : > { %4034 = vst [vmem:[#allocation46_spill] sm:$0xff] %v3161_v6  ;;  %734 = vst [vmem:[#allocation2 + $0x168] sm:$0xff] %v595_v40  ;;  %v3175_v6 = vmul.f32 0.5, %v1666_v4  ;;  %v1762_v20 = vmul.f32 %v1730_v61, %v1666_v4  ;;  %v1793_v44 = vmul.f32 %v1761_v55, %v1665_v1  ;;  %v989_v33 = vmul.f32 %v2810_v39, %v2874_v18 }
 0x110   : > { %v3164_v16 = vld [vmem:[#allocation2 + $0x14f] sm:$0xff]  ;;  %4036 = vst [vmem:[#allocation48_spill] sm:$0xff] %v3170_v41  ;;  %4037 = vst [vmem:[#allocation49_spill] sm:$0xff] %v3173_v8  ;;  %v619_v61 = vadd.f32 %v2465_v43, %v2792_v29  ;;  %v3195_v47 = vmul.f32 %v2802_v34, %v606_v42  ;;  %v610_v18 = vpop.f32.mrf.mxu0 }
 0x111   : > { %4035 = vst [vmem:[#allocation47_spill] sm:$0xff] %v3164_v16  ;;  %v969_v46 = vld [vmem:[#allocation2 + $0x149] sm:$0xff]  ;;  %v970_v48 = vld [vmem:[#allocation2 + $0x151] sm:$0xff]  ;;  %737 = vst [vmem:[#allocation2 + $0x190] sm:$0xff] %v606_v42  ;;  %v3183_v25 = vmul.f32 %v2797_v30, %v3164_v16  ;;  %v611_v42 = vadd.f32 %v2792_v29, %v610_v18  ;;  %v1825_v16 = vadd.f32 %v1793_v44, %v1665_v1 }
 0x112   : > { %v3186_v40 = vmul.f32 %v2810_v39, %v969_v46  ;;  %v3189_v8 = vmul.f32 %v2810_v39, %v970_v48  ;;  %4042 = vst [vmem:[#allocation54_spill] sm:$0xff] %v3195_v47  ;;  %735 = vst [vmem:[#allocation2 + $0x170] sm:$0xff] %v598_v28  ;;  %v1090_v46 = vmul.f32 %v2839_v63, %v2923_v56  ;;  %v2466_v56 = vpop.f32.mrf.mxu0 }
 0x113   : > { %4038 = vst [vmem:[#allocation50_spill] sm:$0xff] %v3183_v25  ;;  %v3191_v41 = vld [vmem:[#allocation2 + $0x12f] sm:$0xff]  ;;  %v771_v55 = vld [vmem:[#allocation2 + $0x187] sm:$0xff]  ;;  %v990_v25 = vmul.f32 %v2810_v39, %v2883_v23  ;;  %v1091_v48 = vmul.f32 %v2839_v63, %v2977_v49  ;;  %740 = vst [vmem:[#allocation2 + $0x1c8] sm:$0xff] %v619_v61  ;;  %v1794_v47 = vmul.f32 %v1762_v20, %v1666_v4  ;;  %v1857_v44 = vmul.f32 0.7978846, %v1825_v16 }
 0x114   : > { %4039 = vst [vmem:[#allocation51_spill] sm:$0xff] %v3186_v40  ;;  %4040 = vst [vmem:[#allocation52_spill] sm:$0xff] %v3189_v8  ;;  %v967_v10 = vld [vmem:[#allocation2 + $0x129] sm:$0xff]  ;;  %v968_v52 = vld [vmem:[#allocation2 + $0x131] sm:$0xff]  ;;  %v3205_v8 = vmul.f32 %v2797_v30, %v3191_v41  ;;  %v1021_v49 = vadd.f32 %v989_v33, %v2892_v26  ;;  %v622_v18 = vadd.f32 %v2466_v56, %v2792_v29 }
 0x115   : > { %4041 = vst [vmem:[#allocation53_spill] sm:$0xff] %v3191_v41  ;;  %v3208_v43 = vmul.f32 %v2810_v39, %v967_v10  ;;  %v3212_v40 = vmul.f32 %v2810_v39, %v968_v52  ;;  %v1022_v19 = vadd.f32 %v990_v25, %v921_v62  ;;  %v3218_v41 = vmul.f32 %v2797_v30, %v771_v55 }
 0x116   : > { %4043 = vst [vmem:[#allocation55_spill] sm:$0xff] %v3205_v8  ;;  %v3214_v23 = vld [vmem:[#allocation2 + $0x167] sm:$0xff]  ;;  %v3221_v10 = vmul.f32 %v2802_v34, %v598_v28  ;;  %738 = vst [vmem:[#allocation2 + $0x1a8] sm:$0xff] %v611_v42  ;;  %v1826_v20 = vadd.f32 %v1794_v47, %v1666_v4  ;;  %v613_v8 = vpop.f32.mrf.mxu0  ;;  %v1122_v1 = vadd.f32 %v1090_v46, %v1021_v49  ;;  %2576 = vtanh.f32 %v1857_v44 }
 0x117   : > { %4044 = vst [vmem:[#allocation56_spill] sm:$0xff] %v3208_v43  ;;  %4045 = vst [vmem:[#allocation57_spill] sm:$0xff] %v3212_v40  ;;  %v3225_v40 = vmul.f32 %v2802_v34, %v619_v61  ;;  %v1123_v26 = vadd.f32 %v1091_v48, %v1022_v19  ;;  %v3229_v25 = vmul.f32 %v2797_v30, %v3214_v23  ;;  %v2573_v47 = vpop.eup %2572 }
 0x118   : > { %v772_v43 = vld [vmem:[#allocation2 + $0x18f] sm:$0xff]  ;;  %v3232_v28 = vmul.f32 %v2802_v34, %v611_v42  ;;  %741 = vst [vmem:[#allocation2 + $0x1d0] sm:$0xff] %v622_v18  ;;  %v1192_v4 = vmul.f32 %v2820_v51, %v2900_v36  ;;  %v1292_v33 = vmul.f32 %v2872_v17, %v2979_v50  ;;  %v614_v61 = vadd.f32 %v2792_v29, %v613_v8  ;;  %v2469_v16 = vpop.f32.mrf.mxu0 }
 0x119   : > { %v973_v52 = vld [vmem:[#allocation2 + $0x189] sm:$0xff]  ;;  %4046 = vst [vmem:[#allocation58_spill] sm:$0xff] %v3225_v40  ;;  %v974_v62 = vld [vmem:[#allocation2 + $0x191] sm:$0xff]  ;;  %v1858_v55 = vmul.f32 0.7978846, %v1826_v20  ;;  %v1223_v19 = vadd.f32 %v2895_v27, %v1122_v1  ;;  %v3241_v46 = vmul.f32 %v2797_v30, %v772_v43  ;;  %v635_v36 = vadd.f32 %v2469_v16, %v2792_v29 }
 0x11a   : > { %4047 = vst [vmem:[#allocation59_spill] sm:$0xff] %v3232_v28  ;;  %v3244_v48 = vmul.f32 %v2810_v39, %v973_v52  ;;  %v3246_v42 = vld [vmem:[#allocation2 + $0x16f] sm:$0xff]  ;;  %v1224_v56 = vadd.f32 %v1192_v4, %v1123_v26  ;;  %v3250_v50 = vmul.f32 %v2810_v39, %v974_v62  ;;  %v3253_v20 = vmul.f32 %v2802_v34, %v622_v18  ;;  %v626_v27 = vpop.f32.mrf.mxu0  ;;  %v2575_v44 = vpop.eup %2574  ;;  %v775_v18 = vld [vmem:[#allocation2 + $0x1c7] sm:$0xff] }
 0x11b   : > { %4048 = vst [vmem:[#allocation60_spill] sm:$0xff] %v3241_v46  ;;  %v971_v8 = vld [vmem:[#allocation2 + $0x169] sm:$0xff]  ;;  %v972_v49 = vld [vmem:[#allocation2 + $0x171] sm:$0xff]  ;;  %739 = vst [vmem:[#allocation2 + $0x1b0] sm:$0xff] %v614_v61  ;;  %v1293_v43 = vmul.f32 %v2872_v17, %v2981_v31  ;;  %v1394_v52 = vmul.f32 %v2849_v3, %v2913_v45  ;;  %v3261_v1 = vmul.f32 %v2797_v30, %v3246_v42  ;;  %v1919_v62 = vadd.f32 1.0, %v2573_v47 }
 0x11c   : > { %4049 = vst [vmem:[#allocation61_spill] sm:$0xff] %v3244_v48  ;;  %4050 = vst [vmem:[#allocation62_spill] sm:$0xff] %v3250_v50  ;;  %v627_v26 = vadd.f32 %v2792_v29, %v626_v27  ;;  %2578 = vtanh.f32 %v1858_v55  ;;  %v2470_v16 = vpop.f32.mrf.mxu0  ;;  %v1324_v40 = vadd.f32 %v1292_v33, %v1223_v19  ;;  %v1395_v31 = vmul.f32 %v2849_v3, %v2938_v9 }
 0x11d   : > { %4051 = vst [vmem:[#allocation63_spill] sm:$0xff] %v3253_v20  ;;  %744 = vst [vmem:[#allocation2 + $0x208] sm:$0xff] %v635_v36  ;;  %v773_v4 = vld [vmem:[#allocation2 + $0x1a7] sm:$0xff]  ;;  %v1920_v20 = vadd.f32 1.0, %v2575_v44  ;;  %v1325_v28 = vadd.f32 %v1293_v43, %v1224_v56  ;;  %v3267_v50 = vmul.f32 %v2810_v39, %v971_v8  ;;  %v3270_v48 = vmul.f32 %v2810_v39, %v972_v49 }
 0x11e   : > { %742 = vst [vmem:[#allocation2 + $0x1e8] sm:$0xff] %v627_v26  ;;  %v638_v36 = vadd.f32 %v2470_v16, %v2792_v29  ;;  %v1951_v55 = vmul.f32 %v1919_v62, %v3085_v13  ;;  %v629_v47 = vpop.f32.mrf.mxu0  ;;  %v1426_v44 = vadd.f32 %v1394_v52, %v1324_v40  ;;  %v1496_v19 = vmul.f32 %v2826_v53, %v2862_v12 }
 0x11f   : > { %v1952_v27 = vmul.f32 %v1920_v20, %v3115_v59  ;;  %v1427_v33 = vadd.f32 %v1395_v31, %v1325_v28  ;;  %v3278_v56 = vmul.f32 %v2797_v30, %v775_v18  ;;  %v3281_v8 = vmul.f32 %v2797_v30, %v773_v4  ;;  %v776_v49 = vld [vmem:[#allocation2 + $0x1cf] sm:$0xff] }
 0x120   : > { %v977_v43 = vld [vmem:[#allocation2 + $0x1c9] sm:$0xff]  ;;  %v978_v46 = vld [vmem:[#allocation2 + $0x1d1] sm:$0xff]  ;;  %v3284_v16 = vmul.f32 %v2802_v34, %v614_v61  ;;  %745 = vst [vmem:[#allocation2 + $0x210] sm:$0xff] %v638_v36  ;;  %v630_v13 = vadd.f32 %v2792_v29, %v629_v47  ;;  %v1527_v40 = vadd.f32 %v2881_v22, %v1426_v44  ;;  %v1596_v20 = vmul.f32 %v2963_v14, %v2940_v11 }
 0x121   : > { %v1983_v59 = vpack.c.bf16 %v1952_v27, %v1951_v55  ;;  %v1528_v28 = vadd.f32 %v1496_v19, %v1427_v33  ;;  %v3291_v62 = vmul.f32 %v2802_v34, %v627_v26  ;;  %v1597_v18 = vmul.f32 %v2963_v14, %v2951_v37  ;;  %v1157_v55 = vld [vmem:[#allocation2 + $0x88] sm:$0xff] }
 0x122   : > { %v774_v52 = vld [vmem:[#allocation2 + $0x1af] sm:$0xff]  ;;  %743 = vst [vmem:[#allocation2 + $0x1f0] sm:$0xff] %v630_v13  ;;  %v922_v61 = vadd.f32 %v2886_v24, %v2947_v32  ;;  %v923_v29 = vadd.f32 %v2936_v7, %v3001_v58  ;;  %v3300_v22 = vmul.f32 %v2797_v30, %v776_v49  ;;  %v3303_v4 = vmul.f32 %v2810_v39, %v977_v43 }
 0x123   : > { %v3306_v31 = vmul.f32 %v2810_v39, %v978_v46  ;;  %v975_v26 = vld [vmem:[#allocation2 + $0x1a9] sm:$0xff]  ;;  %2487 = vmatprep.mubr.bf16.mxu0 %v1983_v59  ;;  %v1628_v36 = vadd.f32 %v1596_v20, %v1527_v40  ;;  %v1629_v47 = vadd.f32 %v1597_v18, %v1528_v28  ;;  %v1092_v7 = vmul.f32 %v2839_v63, %v2913_v45  ;;  %v976_v58 = vld [vmem:[#allocation2 + $0x1b1] sm:$0xff]  ;;  %v2577_v49 = vpop.eup %2576 }
 0x124   : > { %v1023_v27 = vadd.f32 %v3005_v5, %v922_v61  ;;  %v1024_v24 = vadd.f32 %v3009_v60, %v923_v29  ;;  %v3313_v32 = vmul.f32 %v2797_v30, %v774_v52  ;;  %v3316_v46 = vmul.f32 %v2802_v34, %v630_v13 }
 0x125   : > { %v777_v44 = vld [vmem:[#allocation2 + $0x1e7] sm:$0xff]  ;;  %v1667_v33 = vadd.f32 %v3015_v15, %v1628_v36  ;;  %v1093_v19 = vmul.f32 %v2839_v63, %v2938_v9  ;;  %v3322_v5 = vmul.f32 %v2810_v39, %v975_v26  ;;  %v3325_v60 = vadd.f32 %v3015_v15, %v1629_v47 }
 0x126   : > { %4052 = vst [vmem:[#allocation64_spill] sm:$0xff] %v3316_v46  ;;  %v1124_v45 = vadd.f32 %v1092_v7, %v1023_v27  ;;  %v1193_v43 = vmul.f32 %v2820_v51, %v1157_v55  ;;  %v1921_v59 = vadd.f32 1.0, %v2577_v49  ;;  %v1194_v34 = vmul.f32 %v2820_v51, %v2862_v12  ;;  %v4053_v49 = vld [vmem:[#allocation8_spill] sm:$0xff] }
 0x127   : > { %v1731_v40 = vmul.f32 0.044715, %v1667_v33  ;;  %v1125_v28 = vadd.f32 %v1093_v19, %v1024_v24  ;;  %v3331_v13 = vmul.f32 %v2810_v39, %v976_v58  ;;  %v3334_v9 = vmul.f32 %v2797_v30, %v777_v44  ;;  %v4059_v46 = vld [vmem:[#allocation4_spill] sm:$0xff] }
 0x128   : > { %v1732_v20 = vmul.f32 0.044715, %v3325_v60  ;;  %v1225_v52 = vadd.f32 %v1193_v43, %v1124_v45  ;;  %v1294_v26 = vmul.f32 %v2872_v17, %v2940_v11  ;;  %v1295_v36 = vmul.f32 %v2872_v17, %v2951_v37 }
 0x129   : > { %v2579_v18 = vpop.eup %2578  ;;  %v1763_v61 = vmul.f32 %v1731_v40, %v1667_v33  ;;  %v1226_v29 = vadd.f32 %v1194_v34, %v1125_v28  ;;  %v1953_v12 = vmul.f32 %v1921_v59, %v3166_v2  ;;  %v3342_v47 = vmul.f32 0.5, %v1667_v33  ;;  %v4054_v40 = vld [vmem:[#allocation22_spill] sm:$0xff] }
 0x12a   : > { %v1922_v55 = vadd.f32 1.0, %v2579_v18  ;;  %v1396_v27 = vmul.f32 %v2849_v3, %v3025_v0  ;;  %v1764_v24 = vmul.f32 %v1732_v20, %v3325_v60  ;;  %v1326_v58 = vadd.f32 %v1294_v26, %v1225_v52  ;;  %v4055_v52 = vld [vmem:[#allocation25_spill] sm:$0xff] }
 0x12b   : > { %v1795_v7 = vmul.f32 %v1763_v61, %v1667_v33  ;;  %v1327_v44 = vadd.f32 %v1295_v36, %v1226_v29  ;;  %v1397_v11 = vmul.f32 %v2849_v3, %v3059_v54  ;;  %v1497_v37 = vmul.f32 %v2826_v53, %v2926_v57  ;;  %v4056_v18 = vld [vmem:[#allocation5_spill] sm:$0xff]  ;;  %v4057_v61 = vld [vmem:[#allocation3_spill] sm:$0xff] }
 0x12c   : > { %v1954_v19 = vmul.f32 %v1922_v55, %v3175_v6  ;;  %v1498_v2 = vmul.f32 %v2826_v53, %v4053_v49  ;;  %v1796_v45 = vmul.f32 %v1764_v24, %v3325_v60  ;;  %v1428_v59 = vadd.f32 %v1396_v27, %v1326_v58  ;;  %v4058_v55 = vld [vmem:[#allocation9_spill] sm:$0xff] }
 0x12d   : > { %v1827_v43 = vadd.f32 %v1795_v7, %v1667_v33  ;;  %v1598_v28 = vmul.f32 %v2963_v14, %v4054_v40  ;;  %v1429_v20 = vadd.f32 %v1397_v11, %v1327_v44  ;;  %v1599_v6 = vmul.f32 %v2963_v14, %v4055_v52  ;;  %v1159_v33 = vld [vmem:[#allocation2 + $0xa8] sm:$0xff]  ;;  %v4060_v7 = vld [vmem:[#allocation10_spill] sm:$0xff] }
 0x12e   : > { %v1984_v34 = vpack.c.bf16 %v1954_v19, %v1953_v12  ;;  %v924_v29 = vadd.f32 %v4057_v61, %v4056_v18  ;;  %v1828_v57 = vadd.f32 %v1796_v45, %v3325_v60  ;;  %v1529_v36 = vadd.f32 %v1497_v37, %v1428_v59  ;;  %v778_v19 = vld [vmem:[#allocation2 + $0x1ef] sm:$0xff]  ;;  %v1362_v61 = vld [vmem:[#allocation2 + $0xc7] sm:$0xff] }
 0x12f   : > { %v1859_v26 = vmul.f32 0.7978846, %v1827_v43  ;;  %v925_v24 = vadd.f32 %v4059_v46, %v4058_v55  ;;  %v1530_v27 = vadd.f32 %v1498_v2, %v1429_v20  ;;  %v1094_v12 = vmul.f32 %v2839_v63, %v3025_v0  ;;  %v4061_v43 = vld [vmem:[#allocation11_spill] sm:$0xff]  ;;  %v979_v59 = vld [vmem:[#allocation2 + $0x1e9] sm:$0xff] }
 0x130   : > { %2488 = vmatmul.mubr.bf16.vlgmr.msra.gmra.mxu0 %v1984_v34  ;;  %v1025_v58 = vadd.f32 %v4060_v7, %v924_v29  ;;  %v1095_v44 = vmul.f32 %v2839_v63, %v3059_v54  ;;  %v1860_v11 = vmul.f32 0.7978846, %v1828_v57  ;;  %v1630_v45 = vadd.f32 %v1598_v28, %v1529_v36  ;;  %v1363_v28 = vld [vmem:[#allocation2 + $0xcf] sm:$0xff] }
 0x131   : > { %2580 = vtanh.f32 %v1859_v26  ;;  %v1026_v37 = vadd.f32 %v4061_v43, %v925_v24  ;;  %v1631_v18 = vadd.f32 %v1599_v6, %v1530_v27  ;;  %v1195_v34 = vmul.f32 %v2820_v51, %v1159_v33  ;;  %v1463_v26 = vld [vmem:[#allocation2 + $0xc8] sm:$0xff]  ;;  %v1464_v36 = vld [vmem:[#allocation2 + $0xd0] sm:$0xff] }
 0x132   : > { %v1126_v46 = vadd.f32 %v1094_v12, %v1025_v58  ;;  %v1196_v2 = vmul.f32 %v2820_v51, %v4053_v49  ;;  %2582 = vtanh.f32 %v1860_v11  ;;  %v3374_v0 = vadd.f32 %v3015_v15, %v1630_v45  ;;  %v1565_v12 = vld [vmem:[#allocation2 + $0xd1] sm:$0xff] }
 0x133   : > { %v1127_v20 = vadd.f32 %v1095_v44, %v1026_v37  ;;  %v1296_v54 = vmul.f32 %v2872_v17, %v4054_v40  ;;  %v3379_v29 = vmul.f32 %v2797_v30, %v778_v19  ;;  %v3382_v6 = vmul.f32 0.5, %v3325_v60  ;;  %v1564_v30 = vld [vmem:[#allocation2 + $0xc9] sm:$0xff]  ;;  %v4063_v37 = vld [vmem:[#allocation18_spill] sm:$0xff] }
 0x134   : > { %v3385_v57 = vadd.f32 %v3015_v15, %v1631_v18  ;;  %v1227_v49 = vadd.f32 %v1195_v34, %v1126_v46  ;;  %v3388_v55 = vmul.f32 %v2810_v39, %v979_v59  ;;  %v1733_v24 = vmul.f32 0.044715, %v3374_v0  ;;  %v4064_v59 = vld [vmem:[#allocation7_spill] sm:$0xff] }
 0x135   : > { %v1228_v40 = vadd.f32 %v1196_v2, %v1127_v20  ;;  %v1297_v33 = vmul.f32 %v2872_v17, %v4055_v52  ;;  %v1398_v7 = vmul.f32 %v2849_v3, %v1362_v61  ;;  %v1399_v58 = vmul.f32 %v2849_v3, %v1363_v28  ;;  %v4065_v20 = vld [vmem:[#allocation28_spill] sm:$0xff] }
 0x136   : > { %4062 = vst [vmem:[#allocation8_spill] sm:$0xff] %v3388_v55  ;;  %v1734_v27 = vmul.f32 0.044715, %v3385_v57  ;;  %v1328_v60 = vadd.f32 %v1296_v54, %v1227_v49  ;;  %v1765_v44 = vmul.f32 %v1733_v24, %v3374_v0  ;;  %v1499_v39 = vmul.f32 %v2826_v53, %v1463_v26  ;;  %v4066_v54 = vld [vmem:[#allocation15_spill] sm:$0xff]  ;;  %v4067_v24 = vld [vmem:[#allocation29_spill] sm:$0xff] }
 0x137   : > { %v1329_v19 = vadd.f32 %v1297_v33, %v1228_v40  ;;  %v1500_v11 = vmul.f32 %v2826_v53, %v1464_v36  ;;  %v1600_v52 = vmul.f32 %v2963_v14, %v1564_v30  ;;  %v926_v18 = vadd.f32 %v4064_v59, %v4063_v37  ;;  %v4068_v33 = vld [vmem:[#allocation12_spill] sm:$0xff]  ;;  %v4069_v37 = vld [vmem:[#allocation31_spill] sm:$0xff] }
 0x138   : > { %v1766_v45 = vmul.f32 %v1734_v27, %v3385_v57  ;;  %v1430_v43 = vadd.f32 %v1398_v7, %v1328_v60  ;;  %v1797_v46 = vmul.f32 %v1765_v44, %v3374_v0  ;;  %v1601_v2 = vmul.f32 %v2963_v14, %v1565_v12  ;;  %v4070_v44 = vld [vmem:[#allocation19_spill] sm:$0xff] }
 0x139   : > { %v1431_v34 = vadd.f32 %v1399_v58, %v1329_v19  ;;  %v927_v61 = vadd.f32 %v4066_v54, %v4065_v20  ;;  %v1027_v40 = vadd.f32 %v4067_v24, %v926_v18  ;;  %v1096_v27 = vmul.f32 %v2839_v63, %v4068_v33 }
 0x13a   : > { %v1798_v28 = vmul.f32 %v1766_v45, %v3385_v57  ;;  %v1531_v49 = vadd.f32 %v1499_v39, %v1430_v43  ;;  %v1829_v60 = vadd.f32 %v1797_v46, %v3374_v0  ;;  %v1097_v58 = vmul.f32 %v2839_v63, %v4070_v44 }
 0x13b   : > { %v1532_v7 = vadd.f32 %v1500_v11, %v1431_v34  ;;  %v1028_v59 = vadd.f32 %v4069_v37, %v927_v61  ;;  %v1128_v20 = vadd.f32 %v1096_v27, %v1027_v40  ;;  %v1197_v45 = vmul.f32 %v2820_v51, %v1463_v26  ;;  %v1364_v26 = vld [vmem:[#allocation2 + $0xe7] sm:$0xff]  ;;  %v1466_v27 = vld [vmem:[#allocation2 + $0xf0] sm:$0xff] }
 0x13c   : > { %v1830_v19 = vadd.f32 %v1798_v28, %v3385_v57  ;;  %v1632_v55 = vadd.f32 %v1600_v52, %v1531_v49  ;;  %v1861_v39 = vmul.f32 0.7978846, %v1829_v60  ;;  %v1198_v54 = vmul.f32 %v2820_v51, %v1464_v36  ;;  %v1365_v49 = vld [vmem:[#allocation2 + $0xef] sm:$0xff] }
 0x13d   : > { %v1633_v43 = vadd.f32 %v1601_v2, %v1532_v7  ;;  %v1129_v18 = vadd.f32 %v1097_v58, %v1028_v59  ;;  %v1229_v46 = vadd.f32 %v1197_v45, %v1128_v20  ;;  %v1298_v34 = vmul.f32 %v2872_v17, %v1564_v30  ;;  %v1566_v59 = vld [vmem:[#allocation2 + $0xe9] sm:$0xff] }
 0x13e   : > { %v2581_v24 = vpop.eup %2580  ;;  %v1862_v33 = vmul.f32 0.7978846, %v1830_v19  ;;  %v3419_v11 = vadd.f32 %v3015_v15, %v1632_v55  ;;  %2584 = vtanh.f32 %v1861_v39  ;;  %v1299_v36 = vmul.f32 %v2872_v17, %v1565_v12  ;;  %v1465_v55 = vld [vmem:[#allocation2 + $0xe8] sm:$0xff]  ;;  %v1567_v12 = vld [vmem:[#allocation2 + $0xf1] sm:$0xff] }
 0x13f   : > { %v1923_v61 = vadd.f32 1.0, %v2581_v24  ;;  %v3423_v52 = vadd.f32 %v3015_v15, %v1633_v43  ;;  %v1230_v28 = vadd.f32 %v1198_v54, %v1129_v18  ;;  %v2583_v2 = vpop.eup %2582  ;;  %v1330_v40 = vadd.f32 %v1298_v34, %v1229_v46  ;;  %v4071_v34 = vld [vmem:[#allocation14_spill] sm:$0xff] }
 0x140   : > { %2586 = vtanh.f32 %v1862_v33  ;;  %v1735_v51 = vmul.f32 0.044715, %v3419_v11  ;;  %v1924_v60 = vadd.f32 1.0, %v2583_v2  ;;  %v3429_v7 = vmul.f32 0.5, %v3374_v0  ;;  %v4073_v2 = vld [vmem:[#allocation21_spill] sm:$0xff] }
 0x141   : > { %v1955_v30 = vmul.f32 %v1923_v61, %v3342_v47  ;;  %v1736_v37 = vmul.f32 0.044715, %v3423_v52  ;;  %v1331_v58 = vadd.f32 %v1299_v36, %v1230_v28  ;;  %v1400_v19 = vmul.f32 %v2849_v3, %v1364_v26  ;;  %v4072_v61 = vld [vmem:[#allocation6_spill] sm:$0xff] }
 0x142   : > { %v1767_v44 = vmul.f32 %v1735_v51, %v3419_v11  ;;  %v1401_v20 = vmul.f32 %v2849_v3, %v1365_v49  ;;  %v1956_v45 = vmul.f32 %v1924_v60, %v3382_v6  ;;  %v1501_v47 = vmul.f32 %v2826_v53, %v1465_v55 }
 0x143   : > { %v1768_v39 = vmul.f32 %v1736_v37, %v3423_v52  ;;  %v1502_v0 = vmul.f32 %v2826_v53, %v1466_v27  ;;  %v1432_v18 = vadd.f32 %v1400_v19, %v1330_v40  ;;  %v1602_v24 = vmul.f32 %v2963_v14, %v1566_v59  ;;  %v4074_v53 = vld [vmem:[#allocation13_spill] sm:$0xff]  ;;  %v4075_v40 = vld [vmem:[#allocation23_spill] sm:$0xff] }
 0x144   : > { %v1799_v43 = vmul.f32 %v1767_v44, %v3419_v11  ;;  %v1433_v54 = vadd.f32 %v1401_v20, %v1331_v58  ;;  %v1985_v33 = vpack.c.bf16 %v1956_v45, %v1955_v30  ;;  %v1603_v3 = vmul.f32 %v2963_v14, %v1567_v12  ;;  %v4076_v30 = vld [vmem:[#allocation30_spill] sm:$0xff]  ;;  %v4077_v45 = vld [vmem:[#allocation24_spill] sm:$0xff] }
 0x145   : > { %v1800_v46 = vmul.f32 %v1768_v39, %v3423_v52  ;;  %v928_v6 = vadd.f32 %v4072_v61, %v4071_v34  ;;  %v1533_v26 = vadd.f32 %v1501_v47, %v1432_v18  ;;  %v929_v51 = vadd.f32 %v4074_v53, %v4073_v2  ;;  %v3459_v18 = vld [vmem:[%s3971_s3 + $0x4] ss:$0 sm:$0xff]  ;;  %v1467_v34 = vld [vmem:[#allocation2 + $0x108] sm:$0xff] }
 0x146   : > { %v1831_v28 = vadd.f32 %v1799_v43, %v3419_v11  ;;  %v1534_v49 = vadd.f32 %v1502_v0, %v1433_v54  ;;  %2491 = vmatprep.mubr.bf16.mxu1 %v1985_v33  ;;  %v1098_v37 = vmul.f32 %v2839_v63, %v4076_v30  ;;  %v1099_v44 = vmul.f32 %v2839_v63, %v3119_v38 }
 0x147   : > { %v1832_v36 = vadd.f32 %v1800_v46, %v3423_v52  ;;  %v1029_v60 = vadd.f32 %v4075_v40, %v928_v6  ;;  %v1634_v19 = vadd.f32 %v1602_v24, %v1533_v26  ;;  %v1030_v39 = vadd.f32 %v4077_v45, %v929_v51  ;;  %v1366_v24 = vld [vmem:[#allocation2 + $0x107] sm:$0xff] }
 0x148   : > { %v1863_v58 = vmul.f32 0.7978846, %v1831_v28  ;;  %v1635_v20 = vadd.f32 %v1603_v3, %v1534_v49  ;;  %v1702_v47 = vmul.f32 0.5, %v3385_v57  ;;  %v1199_v54 = vmul.f32 %v3459_v18, %v1465_v55  ;;  %v1367_v49 = vld [vmem:[#allocation2 + $0x10f] sm:$0xff] }
 0x149   : > { %v1864_v0 = vmul.f32 0.7978846, %v1832_v36  ;;  %v1130_v43 = vadd.f32 %v1098_v37, %v1029_v60  ;;  %v1673_v33 = vadd.f32 %v3015_v15, %v1634_v19  ;;  %v1131_v38 = vadd.f32 %v1099_v44, %v1030_v39  ;;  %v3487_v19 = vld [vmem:[%s3971_s3 + $0x7] ss:$0 sm:$0xff] }
 0x14a   : > { %2588 = vtanh.f32 %v1863_v58  ;;  %v3464_v63 = vadd.f32 %v3015_v15, %v1635_v20  ;;  %v1200_v57 = vmul.f32 %v3459_v18, %v1466_v27  ;;  %v1300_v3 = vmul.f32 %v2872_v17, %v1566_v59  ;;  %v3476_v27 = vld [vmem:[%s3971_s3 + $0x6] ss:$0 sm:$0xff] }
 0x14b   : > { %2590 = vtanh.f32 %v1864_v0  ;;  %v1231_v46 = vadd.f32 %v1199_v54, %v1130_v43  ;;  %v2585_v61 = vpop.eup %2584  ;;  %v3469_v6 = vmul.f32 0.5, %v3419_v11  ;;  %v1737_v55 = vmul.f32 0.044715, %v1673_v33  ;;  %v1569_v43 = vld [vmem:[#allocation2 + $0x111] sm:$0xff] }
 0x14c   : > { %v1738_v28 = vmul.f32 0.044715, %v3464_v63  ;;  %v1301_v26 = vmul.f32 %v2872_v17, %v1567_v12  ;;  %v1925_v53 = vadd.f32 1.0, %v2585_v61  ;;  %v1232_v51 = vadd.f32 %v1200_v57, %v1131_v38  ;;  %v1468_v17 = vld [vmem:[#allocation2 + $0x110] sm:$0xff] }
 0x14d   : > { %v2587_v2 = vpop.eup %2586  ;;  %v1332_v36 = vadd.f32 %v1300_v3, %v1231_v46  ;;  %v1402_v59 = vmul.f32 %v3476_v27, %v1366_v24  ;;  %v3480_v11 = vmul.f32 0.5, %v3423_v52  ;;  %v1769_v60 = vmul.f32 %v1737_v55, %v1673_v33  ;;  %v1568_v12 = vld [vmem:[#allocation2 + $0x109] sm:$0xff]  ;;  %v4078_v55 = vld [vmem:[#allocation35_spill] sm:$0xff] }
 0x14e   : > { %v1926_v40 = vadd.f32 1.0, %v2587_v2  ;;  %v1770_v30 = vmul.f32 %v1738_v28, %v3464_v63  ;;  %v1333_v37 = vadd.f32 %v1301_v26, %v1232_v51  ;;  %v1403_v44 = vmul.f32 %v3476_v27, %v1367_v49  ;;  %v4079_v28 = vld [vmem:[#allocation17_spill] sm:$0xff]  ;;  %v4080_v2 = vld [vmem:[#allocation27_spill] sm:$0xff] }
 0x14f   : > { %v1434_v58 = vadd.f32 %v1402_v59, %v1332_v36  ;;  %v1503_v20 = vmul.f32 %v3487_v19, %v1467_v34  ;;  %v1957_v45 = vmul.f32 %v1925_v53, %v3429_v7  ;;  %v1801_v39 = vmul.f32 %v1769_v60, %v1673_v33  ;;  %v4081_v60 = vld [vmem:[#allocation26_spill] sm:$0xff] }
 0x150   : > { %v1958_v52 = vmul.f32 %v1926_v40, %v1702_v47  ;;  %v1802_v0 = vmul.f32 %v1770_v30, %v3464_v63  ;;  %v1435_v54 = vadd.f32 %v1403_v44, %v1333_v37  ;;  %v1504_v38 = vmul.f32 %v3487_v19, %v1468_v17  ;;  %v3504_v40 = vld [vmem:[%s3971_s3 + $0x3] ss:$0 sm:$0xff] }
 0x151   : > { %v1535_v24 = vadd.f32 %v1503_v20, %v1434_v58  ;;  %v1604_v57 = vmul.f32 %v2963_v14, %v1568_v12  ;;  %v1833_v3 = vadd.f32 %v1801_v39, %v1673_v33  ;;  %v930_v26 = vadd.f32 %v4079_v28, %v4078_v55  ;;  %v4083_v20 = vld [vmem:[#allocation33_spill] sm:$0xff] }
 0x152   : > { %v1986_v46 = vpack.c.bf16 %v1958_v52, %v1957_v45  ;;  %v1834_v61 = vadd.f32 %v1802_v0, %v3464_v63  ;;  %v1536_v49 = vadd.f32 %v1504_v38, %v1435_v54  ;;  %v1605_v7 = vmul.f32 %v2963_v14, %v1569_v43  ;;  %v1368_v38 = vld [vmem:[#allocation2 + $0x127] sm:$0xff]  ;;  %v1369_v55 = vld [vmem:[#allocation2 + $0x12f] sm:$0xff] }
 0x153   : > { %v1636_v47 = vadd.f32 %v1604_v57, %v1535_v24  ;;  %v931_v53 = vadd.f32 %v4080_v2, %v3141_v21  ;;  %v1865_v51 = vmul.f32 0.7978846, %v1833_v3  ;;  %v1031_v59 = vadd.f32 %v3144_v35, %v930_v26  ;;  %v4082_v21 = vld [vmem:[#allocation42_spill] sm:$0xff] }
 0x154   : > { %2492 = vmatmul.mubr.bf16.vlgmr.msra.gmra.mxu1 %v1986_v46  ;;  %v1866_v36 = vmul.f32 0.7978846, %v1834_v61  ;;  %v1100_v30 = vmul.f32 %v3504_v40, %v4081_v60  ;;  %v3508_v37 = vmul.f32 0.5, %v1673_v33  ;;  %v1637_v14 = vadd.f32 %v1605_v7, %v1536_v49  ;;  %v3525_v61 = vld [vmem:[%s3971_s3 + $0x5] ss:$0 sm:$0xff]  ;;  %v1469_v49 = vld [vmem:[#allocation2 + $0x128] sm:$0xff] }
 0x155   : > { %v3511_v44 = vadd.f32 %v3015_v15, %v1636_v47  ;;  %v1032_v58 = vadd.f32 %v4082_v21, %v931_v53  ;;  %2592 = vtanh.f32 %v1865_v51  ;;  %v1101_v35 = vmul.f32 %v3504_v40, %v4083_v20  ;;  %v1470_v7 = vld [vmem:[#allocation2 + $0x130] sm:$0xff] }
 0x156   : > { %v1132_v45 = vadd.f32 %v1100_v30, %v1031_v59  ;;  %v1201_v52 = vmul.f32 %v3459_v18, %v1467_v34  ;;  %2594 = vtanh.f32 %v1866_v36  ;;  %v3518_v0 = vadd.f32 %v3015_v15, %v1637_v14  ;;  %v1570_v36 = vld [vmem:[#allocation2 + $0x129] sm:$0xff]  ;;  %v1571_v14 = vld [vmem:[#allocation2 + $0x131] sm:$0xff] }
 0x157   : > { %v2589_v39 = vpop.eup %2588  ;;  %v1739_v33 = vmul.f32 0.044715, %v3511_v44  ;;  %v1202_v54 = vmul.f32 %v3459_v18, %v1468_v17  ;;  %v1133_v46 = vadd.f32 %v1101_v35, %v1032_v58  ;;  %v1302_v34 = vmul.f32 %v3525_v61, %v1568_v12 }
 0x158   : > { %v2591_v24 = vpop.eup %2590  ;;  %v1927_v57 = vadd.f32 1.0, %v2589_v39  ;;  %v1233_v3 = vadd.f32 %v1201_v52, %v1132_v45  ;;  %v1740_v15 = vmul.f32 0.044715, %v3518_v0  ;;  %v1303_v17 = vmul.f32 %v3525_v61, %v1569_v43 }
 0x159   : > { %v1928_v28 = vadd.f32 1.0, %v2591_v24  ;;  %v1771_v26 = vmul.f32 %v1739_v33, %v3511_v44  ;;  %v1234_v2 = vadd.f32 %v1202_v54, %v1133_v46  ;;  %v1404_v51 = vmul.f32 %v3476_v27, %v1368_v38  ;;  %v4084_v38 = vld [vmem:[#allocation32_spill] sm:$0xff] }
 0x15a   : > { %v1959_v47 = vmul.f32 %v1927_v57, %v3469_v6  ;;  %v1334_v53 = vadd.f32 %v1302_v34, %v1233_v3  ;;  %v1772_v12 = vmul.f32 %v1740_v15, %v3518_v0  ;;  %v1405_v30 = vmul.f32 %v3476_v27, %v1369_v55  ;;  %v4085_v24 = vld [vmem:[#allocation16_spill] sm:$0xff]  ;;  %v4086_v34 = vld [vmem:[#allocation37_spill] sm:$0xff]  ;;  %v4088_v15 = vld [vmem:[#allocation43_spill] sm:$0xff] }
 0x15b   : > { %v1960_v59 = vmul.f32 %v1928_v28, %v3480_v11  ;;  %v1803_v60 = vmul.f32 %v1771_v26, %v3511_v44  ;;  %v1335_v21 = vadd.f32 %v1303_v17, %v1234_v2  ;;  %v1505_v58 = vmul.f32 %v3487_v19, %v1469_v49  ;;  %v3544_v11 = vld [vmem:[%s3971_s3 + $0x8] ss:$0 sm:$0xff]  ;;  %v4089_v2 = vld [vmem:[#allocation38_spill] sm:$0xff] }
 0x15c   : > { %v1436_v43 = vadd.f32 %v1404_v51, %v1334_v53  ;;  %v1506_v6 = vmul.f32 %v3487_v19, %v1470_v7  ;;  %v1804_v35 = vmul.f32 %v1772_v12, %v3518_v0  ;;  %v1606_v52 = vmul.f32 %v3544_v11, %v1570_v36  ;;  %v4087_v55 = vld [vmem:[#allocation20_spill] sm:$0xff]  ;;  %v4090_v51 = vld [vmem:[#allocation53_spill] sm:$0xff] }
 0x15d   : > { %v1987_v20 = vpack.c.bf16 %v1960_v59, %v1959_v47  ;;  %v1835_v45 = vadd.f32 %v1803_v60, %v3511_v44  ;;  %v1437_v39 = vadd.f32 %v1405_v30, %v1335_v21  ;;  %v1607_v54 = vmul.f32 %v3544_v11, %v1571_v14  ;;  %v4091_v30 = vld [vmem:[#allocation39_spill] sm:$0xff] }
 0x15e   : > { %v1537_v33 = vadd.f32 %v1505_v58, %v1436_v43  ;;  %v932_v57 = vadd.f32 %v4085_v24, %v4084_v38  ;;  %v1836_v46 = vadd.f32 %v1804_v35, %v3518_v0  ;;  %v933_v28 = vadd.f32 %v4087_v55, %v4086_v34  ;;  %v3563_v58 = vld [vmem:[%s3972_s4] ss:$0 sm:$0xff] }
 0x15f   : > { %2495 = vmatprep.mubr.bf16.mxu1 %v1987_v20  ;;  %v1867_v3 = vmul.f32 0.7978846, %v1835_v45  ;;  %v1102_v26 = vmul.f32 %v3504_v40, %v4088_v15  ;;  %v1538_v17 = vadd.f32 %v1506_v6, %v1437_v39  ;;  %v1103_v59 = vmul.f32 %v3504_v40, %v4090_v51 }
 0x160   : > { %v1638_v47 = vadd.f32 %v1606_v52, %v1537_v33  ;;  %v1033_v53 = vadd.f32 %v4089_v2, %v932_v57  ;;  %v1706_v12 = vmul.f32 0.5, %v3464_v63  ;;  %v1868_v60 = vmul.f32 0.7978846, %v1836_v46  ;;  %v1370_v33 = vld [vmem:[#allocation2 + $0x147] sm:$0xff] }
 0x161   : > { %2596 = vtanh.f32 %v1867_v3  ;;  %v1034_v21 = vadd.f32 %v4091_v30, %v933_v28  ;;  %v1639_v43 = vadd.f32 %v1607_v54, %v1538_v17  ;;  %v1203_v35 = vmul.f32 %v3459_v18, %v1469_v49  ;;  %v1371_v3 = vld [vmem:[#allocation2 + $0x14f] sm:$0xff] }
 0x162   : > { %v3566_v6 = vadd.f32 %v3563_v58, %v1638_v47  ;;  %v1134_v20 = vadd.f32 %v1102_v26, %v1033_v53  ;;  %v2593_v45 = vpop.eup %2592  ;;  %2598 = vtanh.f32 %v1868_v60  ;;  %v1204_v63 = vmul.f32 %v3459_v18, %v1470_v7  ;;  %v1471_v7 = vld [vmem:[#allocation2 + $0x148] sm:$0xff]  ;;  %v1472_v17 = vld [vmem:[#allocation2 + $0x150] sm:$0xff] }
 0x163   : > { %v1135_v52 = vadd.f32 %v1103_v59, %v1034_v21  ;;  %v1304_v39 = vmul.f32 %v3525_v61, %v1570_v36  ;;  %v2595_v54 = vpop.eup %2594  ;;  %v1929_v38 = vadd.f32 1.0, %v2593_v45  ;;  %v3572_v24 = vmul.f32 0.5, %v3511_v44  ;;  %v1572_v59 = vld [vmem:[#allocation2 + $0x149] sm:$0xff]  ;;  %v1573_v21 = vld [vmem:[#allocation2 + $0x151] sm:$0xff] }
 0x164   : > { %v3575_v57 = vadd.f32 %v3563_v58, %v1639_v43  ;;  %v1741_v46 = vmul.f32 0.044715, %v3566_v6  ;;  %v1930_v49 = vadd.f32 1.0, %v2595_v54  ;;  %v1235_v34 = vadd.f32 %v1203_v35, %v1134_v20 }
 0x165   : > { %v1236_v55 = vadd.f32 %v1204_v63, %v1135_v52  ;;  %v1305_v28 = vmul.f32 %v3525_v61, %v1571_v14  ;;  %v1961_v36 = vmul.f32 %v1929_v38, %v3508_v37  ;;  %v1406_v44 = vmul.f32 %v3476_v27, %v1370_v33 }
 0x166   : > { %v1742_v15 = vmul.f32 0.044715, %v3575_v57  ;;  %v1773_v26 = vmul.f32 %v1741_v46, %v3566_v6  ;;  %v1962_v47 = vmul.f32 %v1930_v49, %v1706_v12  ;;  %v1336_v2 = vadd.f32 %v1304_v39, %v1235_v34  ;;  %v4092_v39 = vld [vmem:[#allocation48_spill] sm:$0xff]  ;;  %v4095_v49 = vld [vmem:[#allocation45_spill] sm:$0xff] }
 0x167   : > { %v1337_v53 = vadd.f32 %v1305_v28, %v1236_v55  ;;  %v1407_v51 = vmul.f32 %v3476_v27, %v1371_v3  ;;  %v1708_v60 = vmul.f32 0.5, %v3518_v0  ;;  %v1507_v37 = vmul.f32 %v3487_v19, %v1471_v7  ;;  %v4093_v0 = vld [vmem:[#allocation36_spill] sm:$0xff]  ;;  %v4094_v3 = vld [vmem:[#allocation55_spill] sm:$0xff] }
 0x168   : > { %v1774_v14 = vmul.f32 %v1742_v15, %v3575_v57  ;;  %v1805_v30 = vmul.f32 %v1773_v26, %v3566_v6  ;;  %v1988_v43 = vpack.c.bf16 %v1962_v47, %v1961_v36  ;;  %v1438_v20 = vadd.f32 %v1406_v44, %v1336_v2  ;;  %v4096_v36 = vld [vmem:[#allocation56_spill] sm:$0xff] }
 0x169   : > { %v1439_v35 = vadd.f32 %v1407_v51, %v1337_v53  ;;  %v1508_v45 = vmul.f32 %v3487_v19, %v1472_v17  ;;  %v1608_v63 = vmul.f32 %v3544_v11, %v1572_v59  ;;  %v934_v33 = vadd.f32 %v4093_v0, %v4092_v39  ;;  %v4097_v26 = vld [vmem:[#allocation40_spill] sm:$0xff]  ;;  %v4098_v53 = vld [vmem:[#allocation57_spill] sm:$0xff] }
 0x16a   : > { %v1806_v12 = vmul.f32 %v1774_v14, %v3575_v57  ;;  %v1837_v52 = vadd.f32 %v1805_v30, %v3566_v6  ;;  %2496 = vmatmul.mubr.bf16.gmra.mxu1 %v1988_v43  ;;  %v1539_v54 = vadd.f32 %v1507_v37, %v1438_v20  ;;  %v1609_v46 = vmul.f32 %v3544_v11, %v1573_v21  ;;  %v4099_v14 = vld [vmem:[#allocation47_spill] sm:$0xff] }
 0x16b   : > { %v1540_v38 = vadd.f32 %v1508_v45, %v1439_v35  ;;  %v935_v34 = vadd.f32 %v4095_v49, %v4094_v3  ;;  %v1035_v15 = vadd.f32 %v4096_v36, %v934_v33  ;;  %v1104_v44 = vmul.f32 %v3504_v40, %v4097_v26  ;;  %v1473_v3 = vld [vmem:[#allocation2 + $0x168] sm:$0xff] }
 0x16c   : > { %v1838_v55 = vadd.f32 %v1806_v12, %v3575_v57  ;;  %v1869_v28 = vmul.f32 0.7978846, %v1837_v52  ;;  %v1640_v47 = vadd.f32 %v1608_v63, %v1539_v54  ;;  %v1105_v30 = vmul.f32 %v3504_v40, %v4099_v14 }
 0x16d   : > { %v1641_v2 = vadd.f32 %v1609_v46, %v1540_v38  ;;  %v1036_v51 = vadd.f32 %v4098_v53, %v935_v34  ;;  %v1136_v20 = vadd.f32 %v1104_v44, %v1035_v15  ;;  %v1205_v35 = vmul.f32 %v3459_v18, %v1471_v7  ;;  %v1372_v38 = vld [vmem:[#allocation2 + $0x167] sm:$0xff]  ;;  %v1373_v46 = vld [vmem:[#allocation2 + $0x16f] sm:$0xff] }
 0x16e   : > { %v2597_v37 = vpop.eup %2596  ;;  %v1870_v43 = vmul.f32 0.7978846, %v1838_v55  ;;  %2600 = vtanh.f32 %v1869_v28  ;;  %v3606_v12 = vadd.f32 %v3563_v58, %v1640_v47  ;;  %v1206_v0 = vmul.f32 %v3459_v18, %v1472_v17  ;;  %v1474_v28 = vld [vmem:[#allocation2 + $0x170] sm:$0xff] }
 0x16f   : > { %v1931_v45 = vadd.f32 1.0, %v2597_v37  ;;  %v3609_v52 = vadd.f32 %v3563_v58, %v1641_v2  ;;  %v1137_v63 = vadd.f32 %v1105_v30, %v1036_v51  ;;  %v2599_v39 = vpop.eup %2598  ;;  %v1237_v33 = vadd.f32 %v1205_v35, %v1136_v20  ;;  %v1574_v44 = vld [vmem:[#allocation2 + $0x169] sm:$0xff]  ;;  %v1575_v47 = vld [vmem:[#allocation2 + $0x171] sm:$0xff] }
 0x170   : > { %2602 = vtanh.f32 %v1870_v43  ;;  %v1306_v54 = vmul.f32 %v3525_v61, %v1572_v59  ;;  %v1932_v49 = vadd.f32 1.0, %v2599_v39  ;;  %v1709_v34 = vmul.f32 0.5, %v3566_v6  ;;  %v4101_v39 = vld [vmem:[#allocation34_spill] sm:$0xff] }
 0x171   : > { %v1963_v7 = vmul.f32 %v1931_v45, %v3572_v24  ;;  %v1307_v55 = vmul.f32 %v3525_v61, %v1573_v21  ;;  %v1743_v36 = vmul.f32 0.044715, %v3606_v12  ;;  %v1744_v15 = vmul.f32 0.044715, %v3609_v52 }
 0x172   : > { %v1238_v26 = vadd.f32 %v1206_v0, %v1137_v63  ;;  %v1338_v17 = vadd.f32 %v1306_v54, %v1237_v33  ;;  %v1964_v59 = vmul.f32 %v1932_v49, %v1708_v60  ;;  %v1408_v2 = vmul.f32 %v3476_v27, %v1372_v38  ;;  %v4100_v63 = vld [vmem:[#allocation44_spill] sm:$0xff]  ;;  %v4102_v54 = vld [vmem:[#allocation50_spill] sm:$0xff]  ;;  %v4103_v38 = vld [vmem:[#allocation41_spill] sm:$0xff] }
 0x173   : > { %v1409_v53 = vmul.f32 %v3476_v27, %v1373_v46  ;;  %v1509_v24 = vmul.f32 %v3487_v19, %v1473_v3  ;;  %v1775_v6 = vmul.f32 %v1743_v36, %v3606_v12  ;;  %v1776_v21 = vmul.f32 %v1744_v15, %v3609_v52 }
 0x174   : > { %v1339_v51 = vadd.f32 %v1307_v55, %v1238_v26  ;;  %v1510_v14 = vmul.f32 %v3487_v19, %v1474_v28  ;;  %v1989_v30 = vpack.c.bf16 %v1964_v59, %v1963_v7  ;;  %v1440_v37 = vadd.f32 %v1408_v2, %v1338_v17  ;;  %v4104_v26 = vld [vmem:[#allocation51_spill] sm:$0xff] }
 0x175   : > { %v1610_v43 = vmul.f32 %v3544_v11, %v1574_v44  ;;  %v1611_v20 = vmul.f32 %v3544_v11, %v1575_v47  ;;  %v1807_v60 = vmul.f32 %v1775_v6, %v3606_v12  ;;  %v1808_v35 = vmul.f32 %v1776_v21, %v3609_v52 }
 0x176   : > { %v1441_v45 = vadd.f32 %v1409_v53, %v1339_v51  ;;  %v936_v0 = vadd.f32 %v4101_v39, %v4100_v63  ;;  %2499 = vmatprep.mubr.bf16.mxu1 %v1989_v30  ;;  %v1541_v33 = vadd.f32 %v1509_v24, %v1440_v37  ;;  %v937_v46 = vadd.f32 %v4103_v38, %v4102_v54  ;;  %v4105_v53 = vld [vmem:[#allocation52_spill] sm:$0xff] }
 0x177   : > { %v1106_v49 = vmul.f32 %v3504_v40, %v3214_v23  ;;  %v1107_v7 = vmul.f32 %v3504_v40, %v3246_v42  ;;  %v1839_v55 = vadd.f32 %v1807_v60, %v3606_v12  ;;  %v1840_v36 = vadd.f32 %v1808_v35, %v3609_v52  ;;  %v1475_v54 = vld [vmem:[#allocation2 + $0x188] sm:$0xff] }
 0x178   : > { %v1542_v15 = vadd.f32 %v1510_v14, %v1441_v45  ;;  %v1037_v17 = vadd.f32 %v4104_v26, %v936_v0  ;;  %v1710_v59 = vmul.f32 0.5, %v3575_v57  ;;  %v1642_v2 = vadd.f32 %v1610_v43, %v1541_v33  ;;  %v1375_v33 = vld [vmem:[#allocation2 + $0x18f] sm:$0xff] }
 0x179   : > { %v1038_v24 = vadd.f32 %v4105_v53, %v937_v46  ;;  %v1207_v6 = vmul.f32 %v3459_v18, %v1473_v3  ;;  %v1871_v21 = vmul.f32 0.7978846, %v1839_v55  ;;  %v1872_v51 = vmul.f32 0.7978846, %v1840_v36  ;;  %v1374_v3 = vld [vmem:[#allocation2 + $0x187] sm:$0xff] }
 0x17a   : > { %v1643_v23 = vadd.f32 %v1611_v20, %v1542_v15  ;;  %v1138_v30 = vadd.f32 %v1106_v49, %v1037_v17  ;;  %v3643_v42 = vadd.f32 %v3563_v58, %v1642_v2  ;;  %v1208_v14 = vmul.f32 %v3459_v18, %v1474_v28  ;;  %v1476_v49 = vld [vmem:[#allocation2 + $0x190] sm:$0xff] }
 0x17b   : > { %v2601_v37 = vpop.eup %2600  ;;  %v1139_v60 = vadd.f32 %v1107_v7, %v1038_v24  ;;  %v1308_v35 = vmul.f32 %v3525_v61, %v1574_v44  ;;  %2604 = vtanh.f32 %v1871_v21  ;;  %v1309_v0 = vmul.f32 %v3525_v61, %v1575_v47  ;;  %v1576_v7 = vld [vmem:[#allocation2 + $0x189] sm:$0xff]  ;;  %v1577_v17 = vld [vmem:[#allocation2 + $0x191] sm:$0xff] }
 0x17c   : > { %v1933_v45 = vadd.f32 1.0, %v2601_v37  ;;  %v3648_v57 = vadd.f32 %v3563_v58, %v1643_v23  ;;  %v1239_v43 = vadd.f32 %v1207_v6, %v1138_v30  ;;  %2606 = vtanh.f32 %v1872_v51 }
 0x17d   : > { %v2603_v63 = vpop.eup %2602  ;;  %v1745_v20 = vmul.f32 0.044715, %v3643_v42  ;;  %v1240_v39 = vadd.f32 %v1208_v14, %v1139_v60  ;;  %v3653_v44 = vmul.f32 0.5, %v3606_v12  ;;  %v1410_v26 = vmul.f32 %v3476_v27, %v1374_v3  ;;  %v4106_v14 = vld [vmem:[#allocation49_spill] sm:$0xff] }
 0x17e   : > { %v1934_v38 = vadd.f32 1.0, %v2603_v63  ;;  %v1965_v28 = vmul.f32 %v1933_v45, %v1709_v34  ;;  %v1746_v46 = vmul.f32 0.044715, %v3648_v57  ;;  %v1340_v36 = vadd.f32 %v1308_v35, %v1239_v43  ;;  %v2643_v63 = vld [vmem:[#allocation2 + $0x187] sm:$0xff] }
 0x17f   : > { %v1777_v55 = vmul.f32 %v1745_v20, %v3643_v42  ;;  %v1341_v15 = vadd.f32 %v1309_v0, %v1240_v39  ;;  %v1411_v53 = vmul.f32 %v3476_v27, %v1375_v33  ;;  %v1511_v34 = vmul.f32 %v3487_v19, %v1475_v54  ;;  %v2644_v39 = vld [vmem:[#allocation2 + $0x18f] sm:$0xff] }
 0x180   : > { %v1966_v2 = vmul.f32 %v1934_v38, %v1710_v59  ;;  %v1778_v47 = vmul.f32 %v1746_v46, %v3648_v57  ;;  %v1442_v24 = vadd.f32 %v1410_v26, %v1340_v36  ;;  %v1512_v6 = vmul.f32 %v3487_v19, %v1476_v49 }
 0x181   : > { %v1809_v12 = vmul.f32 %v1777_v55, %v3643_v42  ;;  %v1612_v21 = vmul.f32 %v3544_v11, %v1576_v7  ;;  %v1443_v30 = vadd.f32 %v1411_v53, %v1341_v15  ;;  %v1613_v37 = vmul.f32 %v3544_v11, %v1577_v17 }
 0x182   : > { %v1990_v51 = vpack.c.bf16 %v1966_v2, %v1965_v28  ;;  %v1810_v23 = vmul.f32 %v1778_v47, %v3648_v57  ;;  %v1543_v60 = vadd.f32 %v1511_v34, %v1442_v24  ;;  %v938_v35 = vadd.f32 %v4106_v14, %v3229_v25  ;;  %v1376_v2 = vld [vmem:[#allocation2 + $0x1a7] sm:$0xff]  ;;  %v1377_v24 = vld [vmem:[#allocation2 + $0x1af] sm:$0xff] }
 0x183   : > { %v1841_v59 = vadd.f32 %v1809_v12, %v3643_v42  ;;  %v939_v45 = vadd.f32 %v3221_v10, %v3261_v1  ;;  %v1544_v3 = vadd.f32 %v1512_v6, %v1443_v30  ;;  %v1108_v20 = vmul.f32 %v2643_v63, %v3504_v40  ;;  %v1477_v6 = vld [vmem:[#allocation2 + $0x1a8] sm:$0xff] }
 0x184   : > { %2500 = vmatmul.mubr.bf16.gmra.mxu1 %v1990_v51  ;;  %v1842_v43 = vadd.f32 %v1810_v23, %v3648_v57  ;;  %v1109_v0 = vmul.f32 %v2644_v39, %v3504_v40  ;;  %v1644_v38 = vadd.f32 %v1612_v21, %v1543_v60  ;;  %v1039_v28 = vadd.f32 %v3267_v50, %v938_v35  ;;  %v1578_v35 = vld [vmem:[#allocation2 + $0x1a9] sm:$0xff] }
 0x185   : > { %v1873_v33 = vmul.f32 0.7978846, %v1841_v59  ;;  %v1040_v46 = vadd.f32 %v3270_v48, %v939_v45  ;;  %v1645_v55 = vadd.f32 %v1613_v37, %v1544_v3  ;;  %v1209_v10 = vmul.f32 %v3459_v18, %v1475_v54  ;;  %v1478_v37 = vld [vmem:[#allocation2 + $0x1b0] sm:$0xff] }
 0x186   : > { %v1874_v25 = vmul.f32 0.7978846, %v1842_v43  ;;  %v1210_v1 = vmul.f32 %v3459_v18, %v1476_v49  ;;  %v3679_v36 = vadd.f32 %v3563_v58, %v1644_v38  ;;  %v1140_v15 = vadd.f32 %v1108_v20, %v1039_v28  ;;  %v1579_v45 = vld [vmem:[#allocation2 + $0x1b1] sm:$0xff] }
 0x187   : > { %2608 = vtanh.f32 %v1873_v33  ;;  %v1141_v26 = vadd.f32 %v1109_v0, %v1040_v46  ;;  %v1712_v47 = vmul.f32 0.5, %v3609_v52  ;;  %v3683_v50 = vadd.f32 %v3563_v58, %v1645_v55 }
 0x188   : > { %2610 = vtanh.f32 %v1874_v25  ;;  %v1310_v48 = vmul.f32 %v3525_v61, %v1576_v7  ;;  %v2605_v53 = vpop.eup %2604  ;;  %v1747_v54 = vmul.f32 0.044715, %v3679_v36  ;;  %v1241_v34 = vadd.f32 %v1209_v10, %v1140_v15  ;;  %v4107_v10 = vld [vmem:[#allocation46_spill] sm:$0xff] }
 0x189   : > { %v1242_v49 = vadd.f32 %v1210_v1, %v1141_v26  ;;  %v1311_v12 = vmul.f32 %v3525_v61, %v1577_v17  ;;  %v2607_v21 = vpop.eup %2606  ;;  %v1935_v51 = vadd.f32 1.0, %v2605_v53  ;;  %v3689_v23 = vmul.f32 0.5, %v3643_v42  ;;  %v2645_v53 = vld [vmem:[#allocation2 + $0x1a7] sm:$0xff] }
 0x18a   : > { %v1748_v52 = vmul.f32 0.044715, %v3683_v50  ;;  %v1412_v30 = vmul.f32 %v3476_v27, %v1376_v2  ;;  %v1936_v7 = vadd.f32 1.0, %v2607_v21  ;;  %v1779_v59 = vmul.f32 %v1747_v54, %v3679_v36  ;;  %v4108_v2 = vld [vmem:[#allocation60_spill] sm:$0xff] }
 0x18b   : > { %v1342_v60 = vadd.f32 %v1310_v48, %v1241_v34  ;;  %v1343_v14 = vadd.f32 %v1311_v12, %v1242_v49  ;;  %v1967_v17 = vmul.f32 %v1935_v51, %v3653_v44  ;;  %v1413_v3 = vmul.f32 %v3476_v27, %v1377_v24  ;;  %v4110_v12 = vld [vmem:[#allocation61_spill] sm:$0xff] }
 0x18c   : > { %v1780_v43 = vmul.f32 %v1748_v52, %v3683_v50  ;;  %v1513_v42 = vmul.f32 %v3487_v19, %v1477_v6  ;;  %v1968_v63 = vmul.f32 %v1936_v7, %v1712_v47  ;;  %v1811_v20 = vmul.f32 %v1779_v59, %v3679_v36  ;;  %v4109_v47 = vld [vmem:[#allocation54_spill] sm:$0xff]  ;;  %v2646_v21 = vld [vmem:[#allocation2 + $0x1af] sm:$0xff] }
 0x18d   : > { %v1444_v39 = vadd.f32 %v1412_v30, %v1342_v60  ;;  %v1514_v0 = vmul.f32 %v3487_v19, %v1478_v37  ;;  %v1445_v38 = vadd.f32 %v1413_v3, %v1343_v14  ;;  %v1614_v28 = vmul.f32 %v3544_v11, %v1578_v35 }
 0x18e   : > { %v1812_v33 = vmul.f32 %v1780_v43, %v3683_v50  ;;  %v1615_v46 = vmul.f32 %v3544_v11, %v1579_v45  ;;  %v1991_v44 = vpack.c.bf16 %v1968_v63, %v1967_v17  ;;  %v1843_v25 = vadd.f32 %v1811_v20, %v3679_v36 }
 0x18f   : > { %v1545_v55 = vadd.f32 %v1513_v42, %v1444_v39  ;;  %v940_v1 = vadd.f32 %v4107_v10, %v3218_v41  ;;  %v1546_v26 = vadd.f32 %v1514_v0, %v1445_v38  ;;  %v941_v48 = vadd.f32 %v4109_v47, %v4108_v2  ;;  %v4111_v41 = vld [vmem:[#allocation62_spill] sm:$0xff]  ;;  %v1378_v38 = vld [vmem:[#allocation2 + $0x1c7] sm:$0xff] }
 0x190   : > { %v1844_v15 = vadd.f32 %v1812_v33, %v3683_v50  ;;  %v1110_v54 = vmul.f32 %v2645_v53, %v3504_v40  ;;  %2503 = vmatprep.mubr.bf16.mxu1 %v1991_v44  ;;  %v1875_v34 = vmul.f32 0.7978846, %v1843_v25  ;;  %v1111_v51 = vmul.f32 %v2646_v21, %v3504_v40  ;;  %v1379_v25 = vld [vmem:[#allocation2 + $0x1cf] sm:$0xff] }
 0x191   : > { %v1646_v49 = vadd.f32 %v1614_v28, %v1545_v55  ;;  %v1041_v24 = vadd.f32 %v4110_v12, %v940_v1  ;;  %v1647_v30 = vadd.f32 %v1615_v46, %v1546_v26  ;;  %v1042_v7 = vadd.f32 %v4111_v41, %v941_v48  ;;  %v1479_v55 = vld [vmem:[#allocation2 + $0x1c8] sm:$0xff] }
 0x192   : > { %v1876_v52 = vmul.f32 0.7978846, %v1844_v15  ;;  %v1211_v59 = vmul.f32 %v3459_v18, %v1477_v6  ;;  %2612 = vtanh.f32 %v1875_v34  ;;  %v1212_v17 = vmul.f32 %v3459_v18, %v1478_v37  ;;  %v1480_v15 = vld [vmem:[#allocation2 + $0x1d0] sm:$0xff] }
 0x193   : > { %v3715_v60 = vadd.f32 %v3563_v58, %v1646_v49  ;;  %v1142_v14 = vadd.f32 %v1110_v54, %v1041_v24  ;;  %v3719_v3 = vadd.f32 %v3563_v58, %v1647_v30  ;;  %v1143_v42 = vadd.f32 %v1111_v51, %v1042_v7  ;;  %v1580_v48 = vld [vmem:[#allocation2 + $0x1c9] sm:$0xff]  ;;  %v1581_v49 = vld [vmem:[#allocation2 + $0x1d1] sm:$0xff]  ;;  %v4112_v30 = vld [vmem:[#allocation59_spill] sm:$0xff] }
 0x194   : > { %v2609_v43 = vpop.eup %2608  ;;  %2614 = vtanh.f32 %v1876_v52  ;;  %v1312_v63 = vmul.f32 %v3525_v61, %v1578_v35  ;;  %v1714_v39 = vmul.f32 0.5, %v3648_v57  ;;  %v3725_v46 = vmul.f32 0.5, %v3679_v36 }
 0x195   : > { %v2611_v20 = vpop.eup %2610  ;;  %v1937_v0 = vadd.f32 1.0, %v2609_v43  ;;  %v1749_v6 = vmul.f32 0.044715, %v3715_v60  ;;  %v1243_v33 = vadd.f32 %v1211_v59, %v1142_v14  ;;  %v1750_v37 = vmul.f32 0.044715, %v3719_v3 }
 0x196   : > { %v1938_v28 = vadd.f32 1.0, %v2611_v20  ;;  %v1244_v44 = vadd.f32 %v1212_v17, %v1143_v42  ;;  %v3729_v10 = vmul.f32 0.5, %v3683_v50  ;;  %v1313_v57 = vmul.f32 %v3525_v61, %v1579_v45  ;;  %v2647_v20 = vld [vmem:[#allocation2 + $0x1c7] sm:$0xff] }
 0x197   : > { %v1781_v35 = vmul.f32 %v1749_v6, %v3715_v60  ;;  %v1344_v1 = vadd.f32 %v1312_v63, %v1243_v33  ;;  %v1969_v26 = vmul.f32 %v1937_v0, %v3689_v23  ;;  %v1782_v36 = vmul.f32 %v1750_v37, %v3719_v3  ;;  %v2648_v33 = vld [vmem:[#allocation2 + $0x1cf] sm:$0xff] }
 0x198   : > { %v1970_v2 = vmul.f32 %v1938_v28, %v1714_v39  ;;  %v1414_v47 = vmul.f32 %v3476_v27, %v1378_v38  ;;  %v1345_v54 = vadd.f32 %v1313_v57, %v1244_v44  ;;  %v1415_v50 = vmul.f32 %v3476_v27, %v1379_v25 }
 0x199   : > { %v1813_v53 = vmul.f32 %v1781_v35, %v3715_v60  ;;  %v1515_v34 = vmul.f32 %v3487_v19, %v1479_v55  ;;  %v1814_v45 = vmul.f32 %v1782_v36, %v3719_v3  ;;  %v1516_v23 = vmul.f32 %v3487_v19, %v1480_v15 }
 0x19a   : > { %v1992_v12 = vpack.c.bf16 %v1970_v2, %v1969_v26  ;;  %v1446_v24 = vadd.f32 %v1414_v47, %v1344_v1  ;;  %v1447_v51 = vadd.f32 %v1415_v50, %v1345_v54  ;;  %v1616_v52 = vmul.f32 %v3544_v11, %v1580_v48  ;;  %v1380_v2 = vld [vmem:[#allocation2 + $0x1e7] sm:$0xff]  ;;  %v1381_v54 = vld [vmem:[#allocation2 + $0x1ef] sm:$0xff] }
 0x19b   : > { %v1845_v21 = vadd.f32 %v1813_v53, %v3715_v60  ;;  %v942_v41 = vadd.f32 %v4112_v30, %v3281_v8  ;;  %v1846_v7 = vadd.f32 %v1814_v45, %v3719_v3  ;;  %v1617_v14 = vmul.f32 %v3544_v11, %v1581_v49  ;;  %v1481_v50 = vld [vmem:[#allocation2 + $0x1e8] sm:$0xff]  ;;  %v1583_v30 = vld [vmem:[#allocation2 + $0x1f1] sm:$0xff] }
 0x19c   : > { %2504 = vmatmul.mubr.bf16.gmra.mxu1 %v1992_v12  ;;  %v1547_v59 = vadd.f32 %v1515_v34, %v1446_v24  ;;  %v943_v17 = vadd.f32 %v3284_v16, %v3313_v32  ;;  %v1548_v42 = vadd.f32 %v1516_v23, %v1447_v51  ;;  %v1112_v39 = vmul.f32 %v2647_v20, %v3504_v40  ;;  %v1482_v34 = vld [vmem:[#allocation2 + $0x1f0] sm:$0xff] }
 0x19d   : > { %v1877_v43 = vmul.f32 0.7978846, %v1845_v21  ;;  %v1043_v63 = vadd.f32 %v3322_v5, %v942_v41  ;;  %v1878_v0 = vmul.f32 0.7978846, %v1846_v7  ;;  %v1113_v38 = vmul.f32 %v2648_v33, %v3504_v40  ;;  %v1582_v23 = vld [vmem:[#allocation2 + $0x1e9] sm:$0xff] }
 0x19e   : > { %v1648_v6 = vadd.f32 %v1616_v52, %v1547_v59  ;;  %v1044_v8 = vadd.f32 %v3331_v13, %v943_v17  ;;  %v1649_v28 = vadd.f32 %v1617_v14, %v1548_v42  ;;  %v1213_v44 = vmul.f32 %v3459_v18, %v1479_v55  ;;  %v2649_v33 = vld [vmem:[#allocation2 + $0x1e7] sm:$0xff] }
 0x19f   : > { %2616 = vtanh.f32 %v1877_v43  ;;  %v1144_v37 = vadd.f32 %v1112_v39, %v1043_v63  ;;  %v2613_v16 = vpop.eup %2612  ;;  %v1214_v25 = vmul.f32 %v3459_v18, %v1480_v15  ;;  %v1314_v26 = vmul.f32 %v3525_v61, %v1580_v48  ;;  %v4113_v63 = vld [vmem:[#allocation58_spill] sm:$0xff] }
 0x1a0   : > { %2618 = vtanh.f32 %v1878_v0  ;;  %v3755_v32 = vadd.f32 %v3563_v58, %v1648_v6  ;;  %v1145_v5 = vadd.f32 %v1113_v38, %v1044_v8  ;;  %v1939_v57 = vadd.f32 1.0, %v2613_v16  ;;  %v4114_v6 = vld [vmem:[#allocation63_spill] sm:$0xff]  ;;  %v2650_v16 = vld [vmem:[#allocation2 + $0x1ef] sm:$0xff] }
 0x1a1   : > { %v2615_v35 = vpop.eup %2614  ;;  %v3759_v13 = vadd.f32 %v3563_v58, %v1649_v28  ;;  %v1245_v1 = vadd.f32 %v1213_v44, %v1144_v37  ;;  %v1315_v53 = vmul.f32 %v3525_v61, %v1581_v49  ;;  %v1717_v12 = vmul.f32 0.5, %v3715_v60 }
 0x1a2   : > { %v1940_v36 = vadd.f32 1.0, %v2615_v35  ;;  %v1751_v55 = vmul.f32 0.044715, %v3755_v32  ;;  %v1246_v47 = vadd.f32 %v1214_v25, %v1145_v5  ;;  %v1971_v15 = vmul.f32 %v1939_v57, %v3725_v46 }
 0x1a3   : > { %v1752_v45 = vmul.f32 0.044715, %v3759_v13  ;;  %v1346_v24 = vadd.f32 %v1314_v26, %v1245_v1  ;;  %v1416_v52 = vmul.f32 %v3476_v27, %v1380_v2  ;;  %v1417_v41 = vmul.f32 %v3476_v27, %v1381_v54 }
 0x1a4   : > { %v1972_v48 = vmul.f32 %v1940_v36, %v3729_v10  ;;  %v1783_v21 = vmul.f32 %v1751_v55, %v3755_v32  ;;  %v1347_v51 = vadd.f32 %v1315_v53, %v1246_v47  ;;  %v1517_v46 = vmul.f32 %v3487_v19, %v1481_v50  ;;  %v980_v55 = vld [vmem:[#allocation2 + $0x1f1] sm:$0xff] }
 0x1a5   : > { %v1784_v49 = vmul.f32 %v1752_v45, %v3759_v13  ;;  %v1518_v60 = vmul.f32 %v3487_v19, %v1482_v34  ;;  %v1448_v14 = vadd.f32 %v1416_v52, %v1346_v24  ;;  %v1618_v10 = vmul.f32 %v3544_v11, %v1582_v23  ;;  %v1382_v45 = vld [vmem:[#allocation2 + $0x207] sm:$0xff] }
 0x1a6   : > { %v1993_v7 = vpack.c.bf16 %v1972_v48, %v1971_v15  ;;  %v1815_v59 = vmul.f32 %v1783_v21, %v3755_v32  ;;  %v1449_v43 = vadd.f32 %v1417_v41, %v1347_v51  ;;  %v1619_v42 = vmul.f32 %v3544_v11, %v1583_v30  ;;  %v1383_v21 = vld [vmem:[#allocation2 + $0x20f] sm:$0xff] }
 0x1a7   : > { %v1816_v17 = vmul.f32 %v1784_v49, %v3759_v13  ;;  %v944_v20 = vadd.f32 %v4113_v63, %v3278_v56  ;;  %v1549_v0 = vadd.f32 %v1517_v46, %v1448_v14  ;;  %v945_v8 = vadd.f32 %v4114_v6, %v3300_v22  ;;  %v1483_v51 = vld [vmem:[#allocation2 + $0x208] sm:$0xff] }
 0x1a8   : > { %2507 = vmatprep.mubr.bf16.mxu1 %v1993_v7  ;;  %v1847_v39 = vadd.f32 %v1815_v59, %v3755_v32  ;;  %v1114_v38 = vmul.f32 %v2649_v33, %v3504_v40  ;;  %v1550_v37 = vadd.f32 %v1518_v60, %v1449_v43  ;;  %v1115_v5 = vmul.f32 %v2650_v16, %v3504_v40  ;;  %v1484_v60 = vld [vmem:[#allocation2 + $0x210] sm:$0xff] }
 0x1a9   : > { %v1848_v28 = vadd.f32 %v1816_v17, %v3759_v13  ;;  %v1045_v44 = vadd.f32 %v3303_v4, %v944_v20  ;;  %v1650_v56 = vadd.f32 %v1618_v10, %v1549_v0  ;;  %v1046_v35 = vadd.f32 %v3306_v31, %v945_v8  ;;  %v1584_v10 = vld [vmem:[#allocation2 + $0x209] sm:$0xff]  ;;  %v1585_v17 = vld [vmem:[#allocation2 + $0x211] sm:$0xff] }
 0x1aa   : > { %v1879_v25 = vmul.f32 0.7978846, %v1847_v39  ;;  %v1215_v57 = vmul.f32 %v3459_v18, %v1481_v50  ;;  %v1651_v26 = vadd.f32 %v1619_v42, %v1550_v37  ;;  %v1216_v2 = vmul.f32 %v3459_v18, %v1482_v34  ;;  %v1080_v20 = vld [vmem:[#allocation2 + $0x207] sm:$0xff]  ;;  %v1081_v39 = vld [vmem:[#allocation2 + $0x20f] sm:$0xff] }
 0x1ab   : > { %v1880_v1 = vmul.f32 0.7978846, %v1848_v28  ;;  %v1146_v22 = vadd.f32 %v1114_v38, %v1045_v44  ;;  %v3791_v47 = vadd.f32 %v3563_v58, %v1650_v56  ;;  %v1147_v4 = vadd.f32 %v1115_v5, %v1046_v35  ;;  %v4115_v5 = vld [vmem:[#allocation64_spill] sm:$0xff] }
 0x1ac   : > { %v2617_v36 = vpop.eup %2616  ;;  %2620 = vtanh.f32 %v1879_v25  ;;  %v1316_v53 = vmul.f32 %v3525_v61, %v1582_v23  ;;  %v3795_v31 = vadd.f32 %v3563_v58, %v1651_v26  ;;  %v1718_v24 = vmul.f32 0.5, %v3719_v3  ;;  %v2651_v23 = vld [vmem:[%s3971_s3 + $0x2] ss:$0 sm:$0xff] }
 0x1ad   : > { %v2619_v54 = vpop.eup %2618  ;;  %v1941_v15 = vadd.f32 1.0, %v2617_v36  ;;  %2622 = vtanh.f32 %v1880_v1  ;;  %v1247_v50 = vadd.f32 %v1215_v57, %v1146_v22  ;;  %v1753_v34 = vmul.f32 0.044715, %v3791_v47  ;;  %v4116_v22 = vld [vmem:[#allocation8_spill] sm:$0xff] }
 0x1ae   : > { %v1942_v18 = vadd.f32 1.0, %v2619_v54  ;;  %v1248_v48 = vadd.f32 %v1216_v2, %v1147_v4  ;;  %v1016_v52 = vmul.f32 %v2651_v23, %v980_v55  ;;  %v1754_v41 = vmul.f32 0.044715, %v3795_v31  ;;  %v1385_v23 = vld [vmem:[#allocation2 + $0x22f] sm:$0xff] }
 0x1af   : > { %v1973_v49 = vmul.f32 %v1941_v15, %v1717_v12  ;;  %v1317_v46 = vmul.f32 %v3525_v61, %v1583_v30  ;;  %v1785_v3 = vmul.f32 %v1753_v34, %v3791_v47  ;;  %v1348_v59 = vadd.f32 %v1316_v53, %v1247_v50 }
 0x1b0   : > { %v1974_v7 = vmul.f32 %v1942_v18, %v1718_v24  ;;  %v1418_v14 = vmul.f32 %v3476_v27, %v1382_v45  ;;  %v1786_v43 = vmul.f32 %v1754_v41, %v3795_v31  ;;  %v1419_v63 = vmul.f32 %v3476_v27, %v1383_v21  ;;  %v1384_v24 = vld [vmem:[#allocation2 + $0x227] sm:$0xff] }
 0x1b1   : > { %v1349_v42 = vadd.f32 %v1317_v46, %v1248_v48  ;;  %v1519_v12 = vmul.f32 %v3487_v19, %v1483_v51  ;;  %v1817_v30 = vmul.f32 %v1785_v3, %v3791_v47  ;;  %v1520_v8 = vmul.f32 %v3487_v19, %v1484_v60  ;;  %v1586_v46 = vld [vmem:[#allocation2 + $0x229] sm:$0xff] }
 0x1b2   : > { %v1994_v0 = vpack.c.bf16 %v1974_v7, %v1973_v49  ;;  %v1450_v6 = vadd.f32 %v1418_v14, %v1348_v59  ;;  %v1818_v33 = vmul.f32 %v1786_v43, %v3795_v31  ;;  %v1620_v28 = vmul.f32 %v3544_v11, %v1584_v10  ;;  %v2653_v59 = vld [vmem:[%s3971_s3 + $0x6] ss:$0 sm:$0xff]  ;;  %v1587_v43 = vld [vmem:[#allocation2 + $0x231] sm:$0xff] }
 0x1b3   : > { %v1451_v38 = vadd.f32 %v1419_v63, %v1349_v42  ;;  %v1621_v37 = vmul.f32 %v3544_v11, %v1585_v17  ;;  %v1849_v27 = vadd.f32 %v1817_v30, %v3791_v47  ;;  %v946_v16 = vadd.f32 %v3291_v62, %v3334_v9  ;;  %v2652_v62 = vld [vmem:[%s3971_s3 + $0x4] ss:$0 sm:$0xff] }
 0x1b4   : > { %2508 = vmatmul.mubr.bf16.gmra.mxu1 %v1994_v0  ;;  %v1551_v44 = vadd.f32 %v1519_v12, %v1450_v6  ;;  %v947_v25 = vadd.f32 %v4115_v5, %v3379_v29  ;;  %v1850_v56 = vadd.f32 %v1818_v33, %v3795_v31  ;;  %v1116_v35 = vmul.f32 %v3504_v40, %v1080_v20 }
 0x1b5   : > { %v1552_v19 = vadd.f32 %v1520_v8, %v1451_v38  ;;  %v1117_v57 = vmul.f32 %v3504_v40, %v1081_v39  ;;  %v1881_v1 = vmul.f32 0.7978846, %v1849_v27  ;;  %v1047_v2 = vadd.f32 %v4116_v22, %v946_v16 }
 0x1b6   : > { %v1652_v26 = vadd.f32 %v1620_v28, %v1551_v44  ;;  %v1048_v36 = vadd.f32 %v1016_v52, %v947_v25  ;;  %v1719_v55 = vmul.f32 0.5, %v3755_v32  ;;  %v1882_v4 = vmul.f32 0.7978846, %v1850_v56 }
 0x1b7   : > { %v1653_v53 = vadd.f32 %v1621_v37, %v1552_v19  ;;  %v1217_v9 = vmul.f32 %v2652_v62, %v1483_v51  ;;  %2624 = vtanh.f32 %v1881_v1  ;;  %v1148_v54 = vadd.f32 %v1116_v35, %v1047_v2 }
 0x1b8   : > { %v3828_v29 = vadd.f32 %v3563_v58, %v1652_v26  ;;  %v1149_v40 = vadd.f32 %v1117_v57, %v1048_v36  ;;  %v1720_v50 = vmul.f32 0.5, %v3759_v13  ;;  %2626 = vtanh.f32 %v1882_v4 }
 0x1b9   : > { %v2621_v15 = vpop.eup %2620  ;;  %v3832_v45 = vadd.f32 %v3563_v58, %v1653_v53  ;;  %v1218_v32 = vmul.f32 %v2652_v62, %v1484_v60  ;;  %v1249_v21 = vadd.f32 %v1217_v9, %v1148_v54  ;;  %v1318_v51 = vmul.f32 %v3525_v61, %v1584_v10 }
 0x1ba   : > { %v2623_v18 = vpop.eup %2622  ;;  %v1943_v34 = vadd.f32 1.0, %v2621_v15  ;;  %v1755_v48 = vmul.f32 0.044715, %v3828_v29  ;;  %v1319_v13 = vmul.f32 %v3525_v61, %v1585_v17  ;;  %v1420_v14 = vmul.f32 %v2653_v59, %v1384_v24  ;;  %v2654_v61 = vld [vmem:[#allocation2 + $0x40] sm:$0xff] }
 0x1bb   : > { %v1944_v52 = vadd.f32 1.0, %v2623_v18  ;;  %v1756_v49 = vmul.f32 0.044715, %v3832_v45  ;;  %v1250_v41 = vadd.f32 %v1218_v32, %v1149_v40  ;;  %v1350_v60 = vadd.f32 %v1318_v51, %v1249_v21  ;;  %v2655_v17 = vld [vmem:[%s3971_s3 + $0x7] ss:$0 sm:$0xff] }
 0x1bc   : > { %v1975_v7 = vmul.f32 %v1943_v34, %v1719_v55  ;;  %v1787_v3 = vmul.f32 %v1755_v48, %v3828_v29  ;;  %v1421_v12 = vmul.f32 %v2653_v59, %v1385_v23  ;;  %v1521_v0 = vmul.f32 %v2655_v17, %v2654_v61 }
 0x1bd   : > { %v1976_v42 = vmul.f32 %v1944_v52, %v1720_v50  ;;  %v1788_v10 = vmul.f32 %v1756_v49, %v3832_v45  ;;  %v1351_v63 = vadd.f32 %v1319_v13, %v1250_v41  ;;  %v1452_v39 = vadd.f32 %v1420_v14, %v1350_v60 }
 0x1be   : > { %v1819_v20 = vmul.f32 %v1787_v3, %v3828_v29  ;;  %v1622_v30 = vmul.f32 %v3544_v11, %v1586_v46  ;;  %v1623_v38 = vmul.f32 %v3544_v11, %v1587_v43  ;;  %v1721_v22 = vmul.f32 0.5, %v3791_v47 }
 0x1bf   : > { %v1995_v6 = vpack.c.bf16 %v1976_v42, %v1975_v7  ;;  %v1820_v8 = vmul.f32 %v1788_v10, %v3832_v45  ;;  %v1453_v33 = vadd.f32 %v1421_v12, %v1351_v63  ;;  %v1553_v37 = vadd.f32 %v1521_v0, %v1452_v39 }
 0x1c0   : > { %v1851_v28 = vadd.f32 %v1819_v20, %v3828_v29  ;;  %v1722_v2 = vmul.f32 0.5, %v3795_v31  ;;  %v1723_v31 = vmul.f32 0.5, %v3828_v29  ;;  %v1724_v48 = vmul.f32 0.5, %v3832_v45  ;;  %v3862_v29 = vld [vmem:[%s3974_s6] ss:$0 sm:$0xff] }
 0x1c1   : > { %2511 = vmatprep.mubr.bf16.mxu1 %v1995_v6  ;;  %v1852_v27 = vadd.f32 %v1820_v8, %v3832_v45  ;;  %v1554_v44 = vadd.f32 %v1521_v0, %v1453_v33  ;;  %v1654_v5 = vadd.f32 %v1622_v30, %v1553_v37 }
 0x1c2   : > { %v1883_v16 = vmul.f32 0.7978846, %v1851_v28 }
 0x1c3   : > { %v1884_v25 = vmul.f32 0.7978846, %v1852_v27  ;;  %v1655_v56 = vadd.f32 %v1623_v38, %v1554_v44  ;;  %v1693_v19 = vadd.f32 %v3563_v58, %v1654_v5 }
 0x1c4   : > { %2628 = vtanh.f32 %v1883_v16  ;;  %v2625_v35 = vpop.eup %2624 }
 0x1c5   : > { %2630 = vtanh.f32 %v1884_v25  ;;  %v1694_v57 = vadd.f32 %v3563_v58, %v1655_v56  ;;  %v2627_v1 = vpop.eup %2626  ;;  %v1945_v11 = vadd.f32 1.0, %v2625_v35  ;;  %v1757_v26 = vmul.f32 0.044715, %v1693_v19 }
 0x1c6   : > { %v1946_v36 = vadd.f32 1.0, %v2627_v1  ;;  %v1725_v46 = vmul.f32 0.5, %v1693_v19 }
 0x1c7   : > { %v1758_v55 = vmul.f32 0.044715, %v1694_v57  ;;  %v1789_v4 = vmul.f32 %v1757_v26, %v1693_v19  ;;  %v1977_v53 = vmul.f32 %v1945_v11, %v1721_v22  ;;  %v1726_v7 = vmul.f32 0.5, %v1694_v57 }
 0x1c8   : > { %v1978_v62 = vmul.f32 %v1946_v36, %v1722_v2 }
 0x1c9   : > { %v1790_v9 = vmul.f32 %v1758_v55, %v1694_v57  ;;  %v1821_v54 = vmul.f32 %v1789_v4, %v1693_v19 }
 0x1ca   : > { %v1996_v40 = vpack.c.bf16 %v1978_v62, %v1977_v53 }
 0x1cb   : > { %v1822_v15 = vmul.f32 %v1790_v9, %v1694_v57  ;;  %v1853_v50 = vadd.f32 %v1821_v54, %v1693_v19 }
 0x1cc   : > { %2512 = vmatmul.mubr.bf16.gmra.mxu1 %v1996_v40 }
 0x1cd   : > { %v1854_v32 = vadd.f32 %v1822_v15, %v1694_v57  ;;  %v1885_v58 = vmul.f32 0.7978846, %v1853_v50 }
 0x1cf   : > { %v1886_v24 = vmul.f32 0.7978846, %v1854_v32  ;;  %2632 = vtanh.f32 %v1885_v58 }
 0x1d1   : > { %v2629_v18 = vpop.eup %2628  ;;  %2634 = vtanh.f32 %v1886_v24 }
 0x1d2   : > { %v2631_v47 = vpop.eup %2630  ;;  %v1947_v34 = vadd.f32 1.0, %v2629_v18 }
 0x1d3   : > { %v1948_v21 = vadd.f32 1.0, %v2631_v47 }
 0x1d4   : > { %v1979_v51 = vmul.f32 %v1947_v34, %v1723_v31 }
 0x1d5   : > { %v1980_v23 = vmul.f32 %v1948_v21, %v1724_v48 }
 0x1d7   : > { %v1997_v52 = vpack.c.bf16 %v1980_v23, %v1979_v51 }
 0x1d9   : > { %2515 = vmatprep.mubr.bf16.mxu1 %v1997_v52 }
 0x1dc   : > { %v2633_v49 = vpop.eup %2632 }
 0x1dd   : > { %v1949_v13 = vadd.f32 1.0, %v2633_v49 }
 0x1de   : > { %v2635_v41 = vpop.eup %2634 }
 0x1df   : > { %v1950_v3 = vadd.f32 1.0, %v2635_v41  ;;  %v1981_v60 = vmul.f32 %v1949_v13, %v1725_v46 }
 0x1e1   : > { %v1982_v59 = vmul.f32 %v1950_v3, %v1726_v7 }
 0x1e3   : > { %v1998_v14 = vpack.c.bf16 %v1982_v59, %v1981_v60 }
 0x1e5   : > { %2516 = vmatmul.mubr.bf16.gmra.mxu1 %v1998_v14 }
 0x1f0   : > { %v2489_v45 = vpop.f32.mrf.mxu0 }
 0x1f1   : > { %v2113_v43 = vadd.f32 %v2489_v45, %v3862_v29 }
 0x1f2   : > { %v2104_v42 = vpop.f32.mrf.mxu0 }
 0x1f3   : > { %2233 = vst.msk [vmem:[%s3867_s17 + $0x10] sm:$0xff] %vm431_vm0, %v2113_v43  ;;  %v2105_v10 = vadd.f32 %v3862_v29, %v2104_v42 }
 0x1f4   : > { %v2490_v63 = vpop.f32.mrf.mxu0 }
 0x1f5   : > { %2231 = vst.msk [vmem:[%s3867_s17] sm:$0xff] %vm431_vm0, %v2105_v10  ;;  %v2116_v12 = vadd.f32 %v2490_v63, %v3862_v29 }
 0x1f6   : > { %v2107_v20 = vpop.f32.mrf.mxu0 }
 0x1f7   : > { %2234 = vst.msk [vmem:[%s3867_s17 + $0x18] sm:$0xff] %vm431_vm0, %v2116_v12  ;;  %v2108_v39 = vadd.f32 %v3862_v29, %v2107_v20 }
 0x1f9   : > { %2232 = vst.msk [vmem:[%s3867_s17 + $0x8] sm:$0xff] %vm431_vm0, %v2108_v39 }
 0x214   : > { %v2493_v61 = vpop.f32.mrf.mxu1 }
 0x215   : > { %v2129_v17 = vadd.f32 %v2493_v61, %v3862_v29 }
 0x216   : > { %v2120_v0 = vpop.f32.mrf.mxu1 }
 0x217   : > { %2237 = vst.msk [vmem:[%s3867_s17 + $0x30] sm:$0xff] %vm431_vm0, %v2129_v17  ;;  %v2121_v30 = vadd.f32 %v3862_v29, %v2120_v0 }
 0x218   : > { %v2494_v6 = vpop.f32.mrf.mxu1 }
 0x219   : > { %2235 = vst.msk [vmem:[%s3867_s17 + $0x20] sm:$0xff] %vm431_vm0, %v2121_v30  ;;  %v2132_v8 = vadd.f32 %v2494_v6, %v3862_v29 }
 0x21a   : > { %v2123_v33 = vpop.f32.mrf.mxu1 }
 0x21b   : > { %2238 = vst.msk [vmem:[%s3867_s17 + $0x38] sm:$0xff] %vm431_vm0, %v2132_v8  ;;  %v2124_v38 = vadd.f32 %v3862_v29, %v2123_v33 }
 0x21d   : > { %2236 = vst.msk [vmem:[%s3867_s17 + $0x28] sm:$0xff] %vm431_vm0, %v2124_v38 }
 0x22a   : > { %v2497_v28 = vpop.f32.mrf.mxu1 }
 0x22b   : > { %v2145_v37 = vadd.f32 %v2497_v28, %v3862_v29 }
 0x22c   : > { %v2136_v27 = vpop.f32.mrf.mxu1 }
 0x22d   : > { %2241 = vst.msk [vmem:[%s3867_s17 + $0x50] sm:$0xff] %vm431_vm0, %v2145_v37  ;;  %v2137_v44 = vadd.f32 %v3862_v29, %v2136_v27 }
 0x22e   : > { %v2498_v16 = vpop.f32.mrf.mxu1 }
 0x22f   : > { %2239 = vst.msk [vmem:[%s3867_s17 + $0x40] sm:$0xff] %vm431_vm0, %v2137_v44  ;;  %v2148_v5 = vadd.f32 %v2498_v16, %v3862_v29 }
 0x230   : > { %v2139_v25 = vpop.f32.mrf.mxu1 }
 0x231   : > { %2242 = vst.msk [vmem:[%s3867_s17 + $0x58] sm:$0xff] %vm431_vm0, %v2148_v5  ;;  %v2140_v56 = vadd.f32 %v3862_v29, %v2139_v25 }
 0x233   : > { %2240 = vst.msk [vmem:[%s3867_s17 + $0x48] sm:$0xff] %vm431_vm0, %v2140_v56 }
 0x244   : > { %v2501_v19 = vpop.f32.mrf.mxu1 }
 0x245   : > { %v2161_v35 = vadd.f32 %v2501_v19, %v3862_v29 }
 0x246   : > { %v2152_v57 = vpop.f32.mrf.mxu1 }
 0x247   : > { %2245 = vst.msk [vmem:[%s3867_s17 + $0x70] sm:$0xff] %vm431_vm0, %v2161_v35  ;;  %v2153_v1 = vadd.f32 %v3862_v29, %v2152_v57 }
 0x248   : > { %v2502_v11 = vpop.f32.mrf.mxu1 }
 0x249   : > { %2243 = vst.msk [vmem:[%s3867_s17 + $0x60] sm:$0xff] %vm431_vm0, %v2153_v1  ;;  %v2164_v26 = vadd.f32 %v2502_v11, %v3862_v29 }
 0x24a   : > { %v2155_v22 = vpop.f32.mrf.mxu1 }
 0x24b   : > { %2246 = vst.msk [vmem:[%s3867_s17 + $0x78] sm:$0xff] %vm431_vm0, %v2164_v26  ;;  %v2156_v2 = vadd.f32 %v3862_v29, %v2155_v22 }
 0x24d   : > { %2244 = vst.msk [vmem:[%s3867_s17 + $0x68] sm:$0xff] %vm431_vm0, %v2156_v2 }
 0x25c   : > { %v2505_v36 = vpop.f32.mrf.mxu1 }
 0x25d   : > { %v2177_v55 = vadd.f32 %v2505_v36, %v3862_v29 }
 0x25e   : > { %v2168_v4 = vpop.f32.mrf.mxu1 }
 0x25f   : > { %2249 = vst.msk [vmem:[%s3867_s17 + $0x90] sm:$0xff] %vm431_vm0, %v2177_v55  ;;  %v2169_v53 = vadd.f32 %v3862_v29, %v2168_v4 }
 0x260   : > { %v2506_v62 = vpop.f32.mrf.mxu1 }
 0x261   : > { %2247 = vst.msk [vmem:[%s3867_s17 + $0x80] sm:$0xff] %vm431_vm0, %v2169_v53  ;;  %v2180_v9 = vadd.f32 %v2506_v62, %v3862_v29 }
 0x262   : > { %v2171_v54 = vpop.f32.mrf.mxu1 }
 0x263   : > { %2250 = vst.msk [vmem:[%s3867_s17 + $0x98] sm:$0xff] %vm431_vm0, %v2180_v9  ;;  %v2172_v40 = vadd.f32 %v3862_v29, %v2171_v54 }
 0x265   : > { %2248 = vst.msk [vmem:[%s3867_s17 + $0x88] sm:$0xff] %vm431_vm0, %v2172_v40 }
 0x274   : > { %v2509_v15 = vpop.f32.mrf.mxu1 }
 0x275   : > { %v2193_v50 = vadd.f32 %v2509_v15, %v3862_v29 }
 0x276   : > { %v2184_v32 = vpop.f32.mrf.mxu1 }
 0x277   : > { %2253 = vst.msk [vmem:[%s3867_s17 + $0xb0] sm:$0xff] %vm431_vm0, %v2193_v50  ;;  %v2185_v58 = vadd.f32 %v3862_v29, %v2184_v32 }
 0x278   : > { %v2510_v24 = vpop.f32.mrf.mxu1 }
 0x279   : > { %2251 = vst.msk [vmem:[%s3867_s17 + $0xa0] sm:$0xff] %vm431_vm0, %v2185_v58  ;;  %v2196_v18 = vadd.f32 %v2510_v24, %v3862_v29 }
 0x27a   : > { %v2187_v47 = vpop.f32.mrf.mxu1 }
 0x27b   : > { %2254 = vst.msk [vmem:[%s3867_s17 + $0xb8] sm:$0xff] %vm431_vm0, %v2196_v18  ;;  %v2188_v34 = vadd.f32 %v3862_v29, %v2187_v47 }
 0x27d   : > { %2252 = vst.msk [vmem:[%s3867_s17 + $0xa8] sm:$0xff] %vm431_vm0, %v2188_v34 }
 0x28c   : > { %v2513_v31 = vpop.f32.mrf.mxu1 }
 0x28d   : > { %v2209_v48 = vadd.f32 %v2513_v31, %v3862_v29 }
 0x28e   : > { %v2200_v21 = vpop.f32.mrf.mxu1 }
 0x28f   : > { %2257 = vst.msk [vmem:[%s3867_s17 + $0xd0] sm:$0xff] %vm431_vm0, %v2209_v48  ;;  %v2201_v51 = vadd.f32 %v3862_v29, %v2200_v21 }
 0x290   : > { %v2514_v23 = vpop.f32.mrf.mxu1 }
 0x291   : > { %2255 = vst.msk [vmem:[%s3867_s17 + $0xc0] sm:$0xff] %vm431_vm0, %v2201_v51  ;;  %v2212_v52 = vadd.f32 %v2514_v23, %v3862_v29 }
 0x292   : > { %v2203_v49 = vpop.f32.mrf.mxu1 }
 0x293   : > { %2258 = vst.msk [vmem:[%s3867_s17 + $0xd8] sm:$0xff] %vm431_vm0, %v2212_v52  ;;  %v2204_v41 = vadd.f32 %v3862_v29, %v2203_v49 }
 0x295   : > { %2256 = vst.msk [vmem:[%s3867_s17 + $0xc8] sm:$0xff] %vm431_vm0, %v2204_v41 }
 0x2a5   : > { %v2517_v13 = vpop.f32.mrf.mxu1 }
 0x2a6   : > { %v2225_v46 = vadd.f32 %v2517_v13, %v3862_v29 }
 0x2a7   : > { %v2216_v7 = vpop.f32.mrf.mxu1 }
 0x2a8   : > { %2261 = vst.msk [vmem:[%s3867_s17 + $0xf0] sm:$0xff] %vm431_vm0, %v2225_v46  ;;  %v2217_v3 = vadd.f32 %v3862_v29, %v2216_v7 }
 0x2a9   : > { %v2518_v60 = vpop.f32.mrf.mxu1 }
 0x2aa   : > { %2259 = vst.msk [vmem:[%s3867_s17 + $0xe0] sm:$0xff] %vm431_vm0, %v2217_v3  ;;  %v2228_v59 = vadd.f32 %v2518_v60, %v3862_v29 }
 0x2ab   : > { %v2219_v14 = vpop.f32.mrf.mxu1 }
 0x2ac   : > { %2262 = vst.msk [vmem:[%s3867_s17 + $0xf8] sm:$0xff] %vm431_vm0, %v2228_v59  ;;  %v2220_v45 = vadd.f32 %v3862_v29, %v2219_v14 }
 0x2ae   : > { %2260 = vst.msk [vmem:[%s3867_s17 + $0xe8] sm:$0xff] %vm431_vm0, %v2220_v45 }
 0x2af PF: > { %s17_s24 = sadd.s32 1, %s2662_s24  }
 0x2b0   : > { %p14_p4 = scmp.ge.s32.totalorder %s17_s24, 4  }
 0x2b2   :  { %16 = sbr.rel (!%p14_p4) target bundleno = 1 (0x1), region = 80 }

</bundles_post_ra>
